<compile_context>
chip_gen: v7x
topology: tpu7x:2x2x1
jax: 0.10.0
libtpu: 0.0.40
codegen_flags: <defaults>
</compile_context>

<pallas_src>
import functools

import jax
import jax.numpy as jnp
from jax.experimental import pallas as pl
from jax.experimental.pallas import tpu as pltpu


def _round_up(x, m):
    return ((x + m - 1) // m) * m


def _pad2(a, rows, cols):
    a = a.astype(jnp.float32)
    return jnp.pad(a, ((0, rows - a.shape[0]), (0, cols - a.shape[1])))


# --------------------------------------------------------------------------
# Fused kernel: grid = (2 phases, n_tiles batch tiles), both "arbitrary"
# --------------------------------------------------------------------------
def predictor_kernel(emb_ref, act_ref, w1e_ref, w1a_ref, gamma_ref, beta_ref,
                     w2_ref, b2_ref, o_ref,
                     h_scr, sum_ref, sq_ref, scale_ref, shift_ref,
                     *, action_dim, inv_batch, store_h):
    phase = pl.program_id(0)   # 0: fc1 + batch stats,  1: BN/ReLU/fc2/L2-norm
    j = pl.program_id(1)       # batch tile index

    def fc1():
        # concat fused: embedding part on the MXU + `action_dim` rank-1
        # broadcast FMAs on the VPU (the action is only a couple lanes wide).
        h = jnp.dot(emb_ref[...], w1e_ref[...],
                    preferred_element_type=jnp.float32)
        for a in range(action_dim):
            h = h + act_ref[:, a:a + 1] * w1a_ref[a:a + 1, :]
        # fc1's bias is intentionally omitted: training-mode BatchNorm
        # subtracts the per-feature batch mean, which cancels it exactly.
        return h

    @pl.when(phase == 0)
    def _fc1_and_stats():
        @pl.when(j == 0)
        def _():
            sum_ref[...] = jnp.zeros_like(sum_ref)
            sq_ref[...] = jnp.zeros_like(sq_ref)

        h = fc1()
        if store_h:
            h_scr[j] = h
        # zero-padded batch rows give h == 0 exactly (no bias), so they add
        # nothing to the sums; the mean divides by the real batch size.
        sum_ref[...] += jnp.sum(h, axis=0, keepdims=True)
        sq_ref[...] += jnp.sum(h * h, axis=0, keepdims=True)

    @pl.when(phase == 1)
    def _bn_relu_fc2_norm():
        @pl.when(j == 0)
        def _():
            # fold the BN affine once:  hn = h * scale + shift
            mean = sum_ref[...] * inv_batch
            var = jnp.maximum(sq_ref[...] * inv_batch - mean * mean, 0.0)
            scale = gamma_ref[...] * jax.lax.rsqrt(var + 1e-5)
            scale_ref[...] = scale
            shift_ref[...] = beta_ref[...] - mean * scale

        h = h_scr[j] if store_h else fc1()
        hn = jnp.maximum(h * scale_ref[...] + shift_ref[...], 0.0)
        y = jnp.dot(hn, w2_ref[...], preferred_element_type=jnp.float32)
        y = y + b2_ref[...]
        # F.normalize(dim=1): y / max(||y||,1e-12) == y*rsqrt(max(||y||^2,1e-24))
        ss = jnp.sum(y * y, axis=1, keepdims=True)
        o_ref[...] = y * jax.lax.rsqrt(jnp.maximum(ss, 1e-24))


# --------------------------------------------------------------------------
# Host-side wrapper
# --------------------------------------------------------------------------
def predictor_forward(embedding, action, params, *, block_b=256,
                      vmem_budget_bytes=24 * 1024 * 1024):
    """embedding: (B, repr_dim), action: (B, action_dim) -> (B, repr_dim)."""
    w1, b1, gamma, beta, w2, b2 = params          # weights stored as [in, out]
    del b1                                        # cancelled by training-mode BN
    B, E = embedding.shape
    A = action.shape[1]
    D = w1.shape[1]
    assert w1.shape[0] == E + A and w2.shape == (D, D)

    Dp = _round_up(D, 128)                        # lane-dense feature dims
    Ep = _round_up(E, 128)
    tb = _round_up(min(block_b, _round_up(B, 8)), 8)   # large batch tiles
    Bp = _round_up(B, tb)
    n_tiles = Bp // tb
    f32 = jnp.float32

    emb_p = _pad2(embedding, Bp, Ep)
    act_p = _pad2(action, Bp, A)                  # action stays A lanes wide
    w1e_p = _pad2(w1[:E], Ep, Dp)                 # fc1 weight, embedding rows
    w1a_p = _pad2(w1[E:], A, Dp)                  # fc1 weight, action rows
    gamma_p = _pad2(gamma.reshape(1, D), 1, Dp)
    beta_p = _pad2(beta.reshape(1, D), 1, Dp)
    w2_p = _pad2(w2, Dp, Dp)
    b2_p = _pad2(b2.reshape(1, D), 1, Dp)

    # Keep the fc1 activations resident in VMEM when they fit the budget,
    # otherwise recompute fc1 in phase 1.  Either way: no h round trip via HBM.
    store_h = (Bp * Dp * 4) <= vmem_budget_bytes
    h_scr_shape = (n_tiles, tb, Dp) if store_h else (1, 8, 128)

    if store_h:
        # Freeze the batch-tile index during phase 1 so emb/act are not
        # re-fetched (h comes from the VMEM scratch instead).
        x_map = lambda p, j: (j * (1 - p) + p * (n_tiles - 1), 0)
    else:
        x_map = lambda p, j: (j, 0)               # refetch & recompute fc1
    res_map = lambda p, j: (0, 0)                 # resident weights / vectors
    out_map = lambda p, j: (p * j, 0)             # only written during phase 1

    kernel = functools.partial(predictor_kernel, action_dim=A,
                               inv_batch=1.0 / B, store_h=store_h)

    fc1_flops = 2 * Bp * (Ep + A) * Dp
    flops = fc1_flops * (1 if store_h else 2) + 2 * Bp * Dp * Dp + 8 * Bp * Dp
    io_bytes = 4 * ((1 if store_h else 2) * Bp * (Ep + A)
                    + (Ep + A + Dp) * Dp + 4 * Dp + Bp * Dp)
    cost = pl.CostEstimate(flops=flops, transcendentals=2 * Bp + Dp,
                           bytes_accessed=io_bytes)

    vmem_est = 4 * (2 * tb * (Ep + A + Dp)              # pipelined in/out tiles
                    + 2 * ((Ep + A + Dp) * Dp + 3 * Dp)  # resident weights
                    + 4 * Dp)                            # stat / scale scratch
    vmem_est += 4 * (Bp * Dp if store_h else 8 * 128)
    vmem_limit = int(min(56 * 2 ** 20, max(32 * 2 ** 20, 2 * vmem_est)))

    out = pl.pallas_call(
        kernel,
        out_shape=jax.ShapeDtypeStruct((Bp, Dp), f32),
        grid=(2, n_tiles),                        # (phase, batch tile)
        in_specs=[
            pl.BlockSpec((tb, Ep), x_map),        # embedding tile
            pl.BlockSpec((tb, A), x_map),         # action tile (A lanes, unpadded)
            pl.BlockSpec((Ep, Dp), res_map),      # w1 embedding part (resident)
            pl.BlockSpec((A, Dp), res_map),       # w1 action part (resident)
            pl.BlockSpec((1, Dp), res_map),       # bn gamma
            pl.BlockSpec((1, Dp), res_map),       # bn beta
            pl.BlockSpec((Dp, Dp), res_map),      # w2 (resident)
            pl.BlockSpec((1, Dp), res_map),       # b2
        ],
        out_specs=pl.BlockSpec((tb, Dp), out_map),
        scratch_shapes=[
            pltpu.VMEM(h_scr_shape, f32),         # fc1 activations (phase 0 -> 1)
            pltpu.VMEM((1, Dp), f32),             # sum(h)
            pltpu.VMEM((1, Dp), f32),             # sum(h*h)
            pltpu.VMEM((1, Dp), f32),             # folded BN scale
            pltpu.VMEM((1, Dp), f32),             # folded BN shift
        ],
        compiler_params=pltpu.CompilerParams(
            dimension_semantics=("arbitrary", "arbitrary"),
            vmem_limit_bytes=vmem_limit),
        cost_estimate=cost,
    )(emb_p, act_p, w1e_p, w1a_p, gamma_p, beta_p, w2_p, b2_p)

    return out[:B, :D]


# --------------------------------------------------------------------------
# Params / reference
# --------------------------------------------------------------------------
def init_params(key, repr_dim, action_dim):
    d_in = repr_dim + action_dim
    k1, k2, k3, k4 = jax.random.split(key, 4)
    # PyTorch Linear default init: U(-1/sqrt(fan_in), 1/sqrt(fan_in))
    bound1 = 1.0 / float(d_in) ** 0.5
    bound2 = 1.0 / float(repr_dim) ** 0.5
    w1 = jax.random.uniform(k1, (d_in, repr_dim), jnp.float32, -bound1, bound1)
    b1 = jax.random.uniform(k2, (1, repr_dim), jnp.float32, -bound1, bound1)
    gamma = jnp.ones((1, repr_dim), jnp.float32)   # BatchNorm1d default weight
    beta = jnp.zeros((1, repr_dim), jnp.float32)   # BatchNorm1d default bias
    w2 = jax.random.uniform(k3, (repr_dim, repr_dim), jnp.float32, -bound2, bound2)
    b2 = jax.random.uniform(k4, (1, repr_dim), jnp.float32, -bound2, bound2)
    return (w1, b1, gamma, beta, w2, b2)


def reference_forward(embedding, action, params):
    """Pure-JAX reference (with the fc1 bias, which training-mode BN cancels)."""
    w1, b1, gamma, beta, w2, b2 = params
    x = jnp.concatenate([embedding, action], axis=1)
    h = x @ w1 + b1
    mean = jnp.mean(h, axis=0, keepdims=True)
    var = jnp.mean((h - mean) ** 2, axis=0, keepdims=True)
    h = (h - mean) / jnp.sqrt(var + 1e-5) * gamma + beta
    h = jnp.maximum(h, 0.0)
    y = h @ w2 + b2
    norm = jnp.sqrt(jnp.sum(y * y, axis=1, keepdims=True))
    return y / jnp.maximum(norm, 1e-12)


# TODO(synk): nn.BatchNorm1d running_mean / running_var (momentum) buffer
# updates are not modeled; only the training-mode forward output is computed.

if __name__ == "__main__":
    repr_dim, action_dim, batch = 256, 2, 44   # batch not a tile multiple ->
                                               # exercises zero-row padding
    key = jax.random.PRNGKey(0)
    k_emb, k_act, k_par = jax.random.split(key, 3)
    embedding = jax.random.normal(k_emb, (batch, repr_dim), jnp.float32)
    action = jax.random.normal(k_act, (batch, action_dim), jnp.float32)
    params = init_params(k_par, repr_dim, action_dim)

    ref = reference_forward(embedding, action, params)

    # default config: one 48-row batch tile, fc1 activations kept in VMEM
    fwd = jax.jit(predictor_forward)
    out = jax.block_until_ready(fwd(embedding, action, params))
    assert out.shape == (batch, repr_dim)
    assert jnp.allclose(out, ref, atol=1e-4, rtol=1e-4), "mismatch (default)"

    # multi-tile path: 3 batch tiles of 16 rows, stats accumulated across tiles
    fwd_tiled = jax.jit(functools.partial(predictor_forward, block_b=16))
    out2 = jax.block_until_ready(fwd_tiled(embedding, action, params))
    assert jnp.allclose(out2, ref, atol=1e-4, rtol=1e-4), "mismatch (tiled)"

    # fallback path: disable the VMEM h-scratch, recompute fc1 in phase 1
    fwd_rc = jax.jit(functools.partial(predictor_forward, vmem_budget_bytes=0))
    out3 = jax.block_until_ready(fwd_rc(embedding, action, params))
    assert jnp.allclose(out3, ref, atol=1e-4, rtol=1e-4), "mismatch (recompute)"

    print("KERNEL_OK")
</pallas_src>

<mosaic_0001>
module attributes {stable_mosaic.version = 11 : i64} {
  func.func @predictor_kernel(%arg0: i32, %arg1: i32, %arg2: memref<48x256xf32, #tpu.memory_space<vmem>>, %arg3: memref<48x2xf32, #tpu.memory_space<vmem>>, %arg4: memref<256x256xf32, #tpu.memory_space<vmem>>, %arg5: memref<2x256xf32, #tpu.memory_space<vmem>>, %arg6: memref<1x256xf32, #tpu.memory_space<vmem>>, %arg7: memref<1x256xf32, #tpu.memory_space<vmem>>, %arg8: memref<256x256xf32, #tpu.memory_space<vmem>>, %arg9: memref<1x256xf32, #tpu.memory_space<vmem>>, %arg10: memref<48x256xf32, #tpu.memory_space<vmem>>, %arg11: memref<1x48x256xf32, #tpu.memory_space<vmem>>, %arg12: memref<1x256xf32, #tpu.memory_space<vmem>>, %arg13: memref<1x256xf32, #tpu.memory_space<vmem>>, %arg14: memref<1x256xf32, #tpu.memory_space<vmem>>, %arg15: memref<1x256xf32, #tpu.memory_space<vmem>>) attributes {dimension_semantics = [#tpu.dimension_semantics<arbitrary>, #tpu.dimension_semantics<arbitrary>], iteration_bounds = array<i64: 2, 1>, scalar_prefetch = 0 : i64, scratch_operands = 5 : i64, tpu.core_type = #tpu.core_type<tc>, window_params = [{transform_indices = @transform_0, window_bounds = array<i64: 48, 256>}, {transform_indices = @transform_1, window_bounds = array<i64: 48, 2>}, {pipeline_mode = #tpu.pipeline_mode<synchronous>, transform_indices = @transform_2, window_bounds = array<i64: 256, 256>}, {pipeline_mode = #tpu.pipeline_mode<synchronous>, transform_indices = @transform_3, window_bounds = array<i64: 2, 256>}, {pipeline_mode = #tpu.pipeline_mode<synchronous>, transform_indices = @transform_4, window_bounds = array<i64: 1, 256>}, {pipeline_mode = #tpu.pipeline_mode<synchronous>, transform_indices = @transform_5, window_bounds = array<i64: 1, 256>}, {pipeline_mode = #tpu.pipeline_mode<synchronous>, transform_indices = @transform_6, window_bounds = array<i64: 256, 256>}, {pipeline_mode = #tpu.pipeline_mode<synchronous>, transform_indices = @transform_7, window_bounds = array<i64: 1, 256>}, {transform_indices = @transform_8, window_bounds = array<i64: 48, 256>}]} {
    %c0_i32 = arith.constant 0 : i32
    %0 = arith.cmpi eq, %arg0, %c0_i32 : i32
    %1 = arith.extui %0 : i1 to i32
    %c0_i32_0 = arith.constant 0 : i32
    %2 = arith.cmpi ne, %1, %c0_i32_0 : i32
    scf.if %2 {
      %c0_i32_2 = arith.constant 0 : i32
      %6 = arith.cmpi eq, %arg1, %c0_i32_2 : i32
      %7 = arith.extui %6 : i1 to i32
      %c0_i32_3 = arith.constant 0 : i32
      %8 = arith.cmpi ne, %7, %c0_i32_3 : i32
      scf.if %8 {
        %cst_26 = arith.constant 0.000000e+00 : f32
        %39 = vector.broadcast %cst_26 : f32 to vector<1x256xf32>
        %c0_27 = arith.constant 0 : index
        %c0_28 = arith.constant 0 : index
        %40 = vector.load %arg12[%c0_27, %c0_28] : memref<1x256xf32, #tpu.memory_space<vmem>>, vector<1x256xf32>
        tpu.vector_store %arg12[%c0_27, %c0_28], %39 {strides = array<i32>} : memref<1x256xf32, #tpu.memory_space<vmem>>, vector<1x256xf32>,
        %cst_29 = arith.constant 0.000000e+00 : f32
        %41 = vector.broadcast %cst_29 : f32 to vector<1x256xf32>
        %c0_30 = arith.constant 0 : index
        %c0_31 = arith.constant 0 : index
        %42 = vector.load %arg13[%c0_30, %c0_31] : memref<1x256xf32, #tpu.memory_space<vmem>>, vector<1x256xf32>
        tpu.vector_store %arg13[%c0_30, %c0_31], %41 {strides = array<i32>} : memref<1x256xf32, #tpu.memory_space<vmem>>, vector<1x256xf32>,
      } else {
      }
      %c0 = arith.constant 0 : index
      %c0_4 = arith.constant 0 : index
      %9 = vector.load %arg2[%c0, %c0_4] : memref<48x256xf32, #tpu.memory_space<vmem>>, vector<48x256xf32>
      %c0_5 = arith.constant 0 : index
      %c0_6 = arith.constant 0 : index
      %10 = vector.load %arg4[%c0_5, %c0_6] : memref<256x256xf32, #tpu.memory_space<vmem>>, vector<256x256xf32>
      %cst = arith.constant dense<0.000000e+00> : vector<48x256xf32>
      %11 = tpu.matmul %9, %10, %cst {dimension_numbers = #tpu.dot_dimension_numbers<[1], [0], [0], [1], [0, 0, 1, 1], [], []>} : vector<48x256xf32>, vector<256x256xf32>, vector<48x256xf32> -> vector<48x256xf32>
      %c0_7 = arith.constant 0 : index
      %c0_8 = arith.constant 0 : index
      %12 = vector.load %arg3[%c0_7, %c0_8] : memref<48x2xf32, #tpu.memory_space<vmem>>, vector<48x1xf32>
      %c0_9 = arith.constant 0 : index
      %c0_10 = arith.constant 0 : index
      %13 = vector.load %arg5[%c0_9, %c0_10] : memref<2x256xf32, #tpu.memory_space<vmem>>, vector<1x256xf32>
      %14 = vector.broadcast %12 : vector<48x1xf32> to vector<48x256xf32>
      %15 = vector.broadcast %13 : vector<1x256xf32> to vector<48x256xf32>
      %16 = arith.mulf %14, %15 : vector<48x256xf32>
      %17 = arith.addf %11, %16 : vector<48x256xf32>
      %c0_11 = arith.constant 0 : index
      %c1 = arith.constant 1 : index
      %18 = vector.load %arg3[%c0_11, %c1] : memref<48x2xf32, #tpu.memory_space<vmem>>, vector<48x1xf32>
      %c1_12 = arith.constant 1 : index
      %c0_13 = arith.constant 0 : index
      %19 = vector.load %arg5[%c1_12, %c0_13] : memref<2x256xf32, #tpu.memory_space<vmem>>, vector<1x256xf32>
      %20 = vector.broadcast %18 : vector<48x1xf32> to vector<48x256xf32>
      %21 = vector.broadcast %19 : vector<1x256xf32> to vector<48x256xf32>
      %22 = arith.mulf %20, %21 : vector<48x256xf32>
      %23 = arith.addf %17, %22 : vector<48x256xf32>
      %24 = arith.index_cast %arg1 : i32 to index
      %c0_14 = arith.constant 0 : index
      %c0_15 = arith.constant 0 : index
      %25 = vector.load %arg11[%24, %c0_14, %c0_15] : memref<1x48x256xf32, #tpu.memory_space<vmem>>, vector<1x48x256xf32>
      %26 = vector.shape_cast %25 : vector<1x48x256xf32> to vector<48x256xf32>
      %27 = vector.shape_cast %23 : vector<48x256xf32> to vector<1x48x256xf32>
      tpu.vector_store %arg11[%24, %c0_14, %c0_15], %27 {strides = array<i32>} : memref<1x48x256xf32, #tpu.memory_space<vmem>>, vector<1x48x256xf32>,
      %c0_16 = arith.constant 0 : index
      %c0_17 = arith.constant 0 : index
      %28 = vector.load %arg12[%c0_16, %c0_17] : memref<1x256xf32, #tpu.memory_space<vmem>>, vector<1x256xf32>
      %cst_18 = arith.constant dense<0.000000e+00> : vector<256xf32>
      %29 = vector.multi_reduction <add>, %23, %cst_18 [0] : vector<48x256xf32> to vector<256xf32>
      %30 = vector.shape_cast %29 : vector<256xf32> to vector<1x256xf32>
      %31 = arith.addf %28, %30 : vector<1x256xf32>
      %c0_19 = arith.constant 0 : index
      %c0_20 = arith.constant 0 : index
      %32 = vector.load %arg12[%c0_19, %c0_20] : memref<1x256xf32, #tpu.memory_space<vmem>>, vector<1x256xf32>
      tpu.vector_store %arg12[%c0_19, %c0_20], %31 {strides = array<i32>} : memref<1x256xf32, #tpu.memory_space<vmem>>, vector<1x256xf32>,
      %c0_21 = arith.constant 0 : index
      %c0_22 = arith.constant 0 : index
      %33 = vector.load %arg13[%c0_21, %c0_22] : memref<1x256xf32, #tpu.memory_space<vmem>>, vector<1x256xf32>
      %34 = arith.mulf %23, %23 : vector<48x256xf32>
      %cst_23 = arith.constant dense<0.000000e+00> : vector<256xf32>
      %35 = vector.multi_reduction <add>, %34, %cst_23 [0] : vector<48x256xf32> to vector<256xf32>
      %36 = vector.shape_cast %35 : vector<256xf32> to vector<1x256xf32>
      %37 = arith.addf %33, %36 : vector<1x256xf32>
      %c0_24 = arith.constant 0 : index
      %c0_25 = arith.constant 0 : index
      %38 = vector.load %arg13[%c0_24, %c0_25] : memref<1x256xf32, #tpu.memory_space<vmem>>, vector<1x256xf32>
      tpu.vector_store %arg13[%c0_24, %c0_25], %37 {strides = array<i32>} : memref<1x256xf32, #tpu.memory_space<vmem>>, vector<1x256xf32>,
    } else {
    }
    %c1_i32 = arith.constant 1 : i32
    %3 = arith.cmpi eq, %arg0, %c1_i32 : i32
    %4 = arith.extui %3 : i1 to i32
    %c0_i32_1 = arith.constant 0 : i32
    %5 = arith.cmpi ne, %4, %c0_i32_1 : i32
    scf.if %5 {
      %c0_i32_2 = arith.constant 0 : i32
      %6 = arith.cmpi eq, %arg1, %c0_i32_2 : i32
      %7 = arith.extui %6 : i1 to i32
      %c0_i32_3 = arith.constant 0 : i32
      %8 = arith.cmpi ne, %7, %c0_i32_3 : i32
      scf.if %8 {
        %c0_18 = arith.constant 0 : index
        %c0_19 = arith.constant 0 : index
        %34 = vector.load %arg12[%c0_18, %c0_19] : memref<1x256xf32, #tpu.memory_space<vmem>>, vector<1x256xf32>
        %cst_20 = arith.constant 0.0227272734 : f32
        %35 = vector.broadcast %cst_20 : f32 to vector<1x256xf32>
        %36 = arith.mulf %34, %35 : vector<1x256xf32>
        %c0_21 = arith.constant 0 : index
        %c0_22 = arith.constant 0 : index
        %37 = vector.load %arg13[%c0_21, %c0_22] : memref<1x256xf32, #tpu.memory_space<vmem>>, vector<1x256xf32>
        %cst_23 = arith.constant 0.0227272734 : f32
        %38 = vector.broadcast %cst_23 : f32 to vector<1x256xf32>
        %39 = arith.mulf %37, %38 : vector<1x256xf32>
        %40 = arith.mulf %36, %36 : vector<1x256xf32>
        %41 = arith.subf %39, %40 : vector<1x256xf32>
        %cst_24 = arith.constant 0.000000e+00 : f32
        %42 = vector.broadcast %cst_24 : f32 to vector<1x256xf32>
        %43 = arith.maximumf %41, %42 : vector<1x256xf32>
        %c0_25 = arith.constant 0 : index
        %c0_26 = arith.constant 0 : index
        %44 = vector.load %arg6[%c0_25, %c0_26] : memref<1x256xf32, #tpu.memory_space<vmem>>, vector<1x256xf32>
        %cst_27 = arith.constant 9.99999974E-6 : f32
        %45 = vector.broadcast %cst_27 : f32 to vector<1x256xf32>
        %46 = arith.addf %43, %45 : vector<1x256xf32>
        %47 = math.rsqrt %46 : vector<1x256xf32>
        %48 = arith.mulf %44, %47 : vector<1x256xf32>
        %c0_28 = arith.constant 0 : index
        %c0_29 = arith.constant 0 : index
        %49 = vector.load %arg14[%c0_28, %c0_29] : memref<1x256xf32, #tpu.memory_space<vmem>>, vector<1x256xf32>
        tpu.vector_store %arg14[%c0_28, %c0_29], %48 {strides = array<i32>} : memref<1x256xf32, #tpu.memory_space<vmem>>, vector<1x256xf32>,
        %c0_30 = arith.constant 0 : index
        %c0_31 = arith.constant 0 : index
        %50 = vector.load %arg7[%c0_30, %c0_31] : memref<1x256xf32, #tpu.memory_space<vmem>>, vector<1x256xf32>
        %51 = arith.mulf %36, %48 : vector<1x256xf32>
        %52 = arith.subf %50, %51 : vector<1x256xf32>
        %c0_32 = arith.constant 0 : index
        %c0_33 = arith.constant 0 : index
        %53 = vector.load %arg15[%c0_32, %c0_33] : memref<1x256xf32, #tpu.memory_space<vmem>>, vector<1x256xf32>
        tpu.vector_store %arg15[%c0_32, %c0_33], %52 {strides = array<i32>} : memref<1x256xf32, #tpu.memory_space<vmem>>, vector<1x256xf32>,
      } else {
      }
      %9 = arith.index_cast %arg1 : i32 to index
      %c0 = arith.constant 0 : index
      %c0_4 = arith.constant 0 : index
      %10 = vector.load %arg11[%9, %c0, %c0_4] : memref<1x48x256xf32, #tpu.memory_space<vmem>>, vector<1x48x256xf32>
      %11 = vector.shape_cast %10 : vector<1x48x256xf32> to vector<48x256xf32>
      %c0_5 = arith.constant 0 : index
      %c0_6 = arith.constant 0 : index
      %12 = vector.load %arg14[%c0_5, %c0_6] : memref<1x256xf32, #tpu.memory_space<vmem>>, vector<1x256xf32>
      %13 = vector.broadcast %12 : vector<1x256xf32> to vector<48x256xf32>
      %14 = arith.mulf %11, %13 : vector<48x256xf32>
      %c0_7 = arith.constant 0 : index
      %c0_8 = arith.constant 0 : index
      %15 = vector.load %arg15[%c0_7, %c0_8] : memref<1x256xf32, #tpu.memory_space<vmem>>, vector<1x256xf32>
      %16 = vector.broadcast %15 : vector<1x256xf32> to vector<48x256xf32>
      %17 = arith.addf %14, %16 : vector<48x256xf32>
      %cst = arith.constant 0.000000e+00 : f32
      %18 = vector.broadcast %cst : f32 to vector<48x256xf32>
      %19 = arith.maximumf %17, %18 : vector<48x256xf32>
      %c0_9 = arith.constant 0 : index
      %c0_10 = arith.constant 0 : index
      %20 = vector.load %arg8[%c0_9, %c0_10] : memref<256x256xf32, #tpu.memory_space<vmem>>, vector<256x256xf32>
      %cst_11 = arith.constant dense<0.000000e+00> : vector<48x256xf32>
      %21 = tpu.matmul %19, %20, %cst_11 {dimension_numbers = #tpu.dot_dimension_numbers<[1], [0], [0], [1], [0, 0, 1, 1], [], []>} : vector<48x256xf32>, vector<256x256xf32>, vector<48x256xf32> -> vector<48x256xf32>
      %c0_12 = arith.constant 0 : index
      %c0_13 = arith.constant 0 : index
      %22 = vector.load %arg9[%c0_12, %c0_13] : memref<1x256xf32, #tpu.memory_space<vmem>>, vector<1x256xf32>
      %23 = vector.broadcast %22 : vector<1x256xf32> to vector<48x256xf32>
      %24 = arith.addf %21, %23 : vector<48x256xf32>
      %25 = arith.mulf %24, %24 : vector<48x256xf32>
      %cst_14 = arith.constant dense<0.000000e+00> : vector<48xf32>
      %26 = vector.multi_reduction <add>, %25, %cst_14 [1] : vector<48x256xf32> to vector<48xf32>
      %27 = vector.shape_cast %26 : vector<48xf32> to vector<48x1xf32>
      %cst_15 = arith.constant 1.000000e-24 : f32
      %28 = vector.broadcast %cst_15 : f32 to vector<48x1xf32>
      %29 = arith.maximumf %27, %28 : vector<48x1xf32>
      %30 = math.rsqrt %29 : vector<48x1xf32>
      %31 = vector.broadcast %30 : vector<48x1xf32> to vector<48x256xf32>
      %32 = arith.mulf %24, %31 : vector<48x256xf32>
      %c0_16 = arith.constant 0 : index
      %c0_17 = arith.constant 0 : index
      %33 = vector.load %arg10[%c0_16, %c0_17] : memref<48x256xf32, #tpu.memory_space<vmem>>, vector<48x256xf32>
      tpu.vector_store %arg10[%c0_16, %c0_17], %32 {strides = array<i32>} : memref<48x256xf32, #tpu.memory_space<vmem>>, vector<48x256xf32>,
    } else {
    }
    return
  }
  func.func @transform_0(%arg0: i32, %arg1: i32) -> (i32, i32) {
    %c1_i32 = arith.constant 1 : i32
    %0 = arith.subi %c1_i32, %arg0 : i32
    %1 = arith.muli %arg1, %0 : i32
    %c0_i32 = arith.constant 0 : i32
    %2 = arith.muli %arg0, %c0_i32 : i32
    %3 = arith.addi %1, %2 : i32
    %c0_i32_0 = arith.constant 0 : i32
    %c0_i32_1 = arith.constant 0 : i32
    return %3, %c0_i32_0 : i32, i32
  }
  func.func @transform_1(%arg0: i32, %arg1: i32) -> (i32, i32) {
    %c1_i32 = arith.constant 1 : i32
    %0 = arith.subi %c1_i32, %arg0 : i32
    %1 = arith.muli %arg1, %0 : i32
    %c0_i32 = arith.constant 0 : i32
    %2 = arith.muli %arg0, %c0_i32 : i32
    %3 = arith.addi %1, %2 : i32
    %c0_i32_0 = arith.constant 0 : i32
    %c0_i32_1 = arith.constant 0 : i32
    return %3, %c0_i32_0 : i32, i32
  }
  func.func @transform_2(%arg0: i32, %arg1: i32) -> (i32, i32) {
    %c0_i32 = arith.constant 0 : i32
    %c0_i32_0 = arith.constant 0 : i32
    %c0_i32_1 = arith.constant 0 : i32
    return %c0_i32, %c0_i32_0 : i32, i32
  }
  func.func @transform_3(%arg0: i32, %arg1: i32) -> (i32, i32) {
    %c0_i32 = arith.constant 0 : i32
    %c0_i32_0 = arith.constant 0 : i32
    %c0_i32_1 = arith.constant 0 : i32
    return %c0_i32, %c0_i32_0 : i32, i32
  }
  func.func @transform_4(%arg0: i32, %arg1: i32) -> (i32, i32) {
    %c0_i32 = arith.constant 0 : i32
    %c0_i32_0 = arith.constant 0 : i32
    %c0_i32_1 = arith.constant 0 : i32
    return %c0_i32, %c0_i32_0 : i32, i32
  }
  func.func @transform_5(%arg0: i32, %arg1: i32) -> (i32, i32) {
    %c0_i32 = arith.constant 0 : i32
    %c0_i32_0 = arith.constant 0 : i32
    %c0_i32_1 = arith.constant 0 : i32
    return %c0_i32, %c0_i32_0 : i32, i32
  }
  func.func @transform_6(%arg0: i32, %arg1: i32) -> (i32, i32) {
    %c0_i32 = arith.constant 0 : i32
    %c0_i32_0 = arith.constant 0 : i32
    %c0_i32_1 = arith.constant 0 : i32
    return %c0_i32, %c0_i32_0 : i32, i32
  }
  func.func @transform_7(%arg0: i32, %arg1: i32) -> (i32, i32) {
    %c0_i32 = arith.constant 0 : i32
    %c0_i32_0 = arith.constant 0 : i32
    %c0_i32_1 = arith.constant 0 : i32
    return %c0_i32, %c0_i32_0 : i32, i32
  }
  func.func @transform_8(%arg0: i32, %arg1: i32) -> (i32, i32) {
    %0 = arith.muli %arg0, %arg1 : i32
    %c0_i32 = arith.constant 0 : i32
    %c0_i32_0 = arith.constant 0 : i32
    return %0, %c0_i32 : i32, i32
  }
}

</mosaic_0001>

<bundles_post_ra>
// kernel: predictor_forward.1
= control target key start
LH: loop header
LB: loop body
LE: loop exit
PB: predicated region body
PF: predicated region fallthrough
CT: control target
= control target key end

     0   :  { %13 = vsyncpa [#allocation8], 0  ;;  %s2224_s0 = inlined_call_operand.vmem [shape: f32[48,256], index: 0, kind: input, shape index: {}]   ;;  %s2225_s1 = inlined_call_operand.vmem [shape: f32[48,2], index: 1, kind: input, shape index: {}]   ;;  %s2226_s2 = inlined_call_operand.vmem [shape: f32[256,256], index: 2, kind: input, shape index: {}]   ;;  %s2227_s3 = inlined_call_operand.vmem [shape: f32[2,256], index: 3, kind: input, shape index: {}]   ;;  %s2228_s4 = inlined_call_operand.vmem [shape: f32[1,256], index: 4, kind: input, shape index: {}]   ;;  %s2229_s5 = inlined_call_operand.vmem [shape: f32[1,256], index: 5, kind: input, shape index: {}]   ;;  %s2230_s6 = inlined_call_operand.vmem [shape: f32[256,256], index: 6, kind: input, shape index: {}]   ;;  %s2231_s7 = inlined_call_operand.vmem [shape: f32[1,256], index: 7, kind: input, shape index: {}]   ;;  %s2232_s8 = inlined_call_operand.hbm [shape: f32[48,256], index: 8, kind: output, shape index: {}]  }
   0x1   :  { %15 = vsyncpa [#allocation8 + $0x1], 0  ;;  %s1629_s27 = smov 0   ;;  %s1631_s28 = smov 0  }
   0x2   :  { %s1633_s29 = smov 0  }
   0x3 LB: > { %s1252_s30 = sadd.s32 4294967295, %s1575_s29   ;;  %s1253_s9 = sadd.s32 4294967294, %s1575_s29   ;;  %s1575_s29 = sphi %s1633_s29, %s21_s29   ;;  %s1571_s28 = sphi %s1631_s28, %s2239_s28   ;;  %s1567_s27 = sphi %s1629_s27, %s2238_s27  }
   0x4   : > { %s33_s10 = sadd.s32 1, %s1571_s28  ;;  %p1258_p0 = scmp.ge.s32.totalorder %s1575_s29, 1 }
   0x5   : > { %p35_p1 = scmp.ge.s32.totalorder %s33_s10, 2  ;;  %p308_p2 = scmp.lt.s32.totalorder %s1575_s29, 3 }
   0x7   : > { %s2241_s10 = smov (%p35_p1, %s33_s10), 0  ;;  %p309_p3 = pnand %p1258_p0, %p308_p2 }
   0x8   : > { %p1259_p4 = scmp.ne.s32.totalorder (!%p309_p3), %s1567_s27, 0 }
   0x9   : > { %312 = sbr.rel (%p309_p3) target bundleno = 820 (0x334), region = 52 }
  0x10   : > { %378 = sbr.rel (%p1259_p4) target bundleno = 339 (0x153), region = 56  ;;  %v402_v0 = vld [vmem:[%s2226_s2 + $0x8] sm:$0xff] (!%p1259_p4)  ;;  %v404_v1 = vld [vmem:[%s2226_s2 + $0x18] sm:$0xff] (!%p1259_p4)  ;;  %v401_v2 = vld [vmem:[%s2226_s2] sm:$0xff] (!%p1259_p4)  ;;  %v1577_v7 = vmov (!%p1259_p4), 0   ;;  %v1578_v8 = vmov (!%p1259_p4), 1  }
  0x11   : > { %v1266_v3 = vpack.c.bf16 (!%p1259_p4), %v404_v1, %v402_v0  ;;  %v403_v4 = vld [vmem:[%s2226_s2 + $0x10] sm:$0xff] (!%p1259_p4)  ;;  %v406_v5 = vld [vmem:[%s2226_s2 + $0x28] sm:$0xff] (!%p1259_p4)  ;;  %v408_v6 = vld [vmem:[%s2226_s2 + $0x38] sm:$0xff] (!%p1259_p4)  ;;  %1500 = vset.pattern.permute.xlu1 (!%p1259_p4), %v1577_v7  ;;  %1502 = vset.pattern.permute.xlu0 (!%p1259_p4), %v1578_v8 }
  0x12   : > { %v1268_v9 = vpack.c.bf16 (!%p1259_p4), %v403_v4, %v401_v2  ;;  %v1270_v10 = vpack.c.bf16 (!%p1259_p4), %v408_v6, %v406_v5  ;;  %v405_v11 = vld [vmem:[%s2226_s2 + $0x20] sm:$0xff] (!%p1259_p4)  ;;  %v407_v12 = vld [vmem:[%s2226_s2 + $0x30] sm:$0xff] (!%p1259_p4)  ;;  %v410_v13 = vld [vmem:[%s2226_s2 + $0x48] sm:$0xff] (!%p1259_p4) }
  0x13   : > { %1267 = vmatprep.subr.bf16.mxu0 (!%p1259_p4), %v1266_v3  ;;  %1394 = vmatprep.subr.bf16.mxu1 (!%p1259_p4), %v1266_v3  ;;  %v412_v14 = vld [vmem:[%s2226_s2 + $0x58] sm:$0xff] (!%p1259_p4)  ;;  %v1272_v15 = vpack.c.bf16 (!%p1259_p4), %v407_v12, %v405_v11  ;;  %v409_v17 = vld [vmem:[%s2226_s2 + $0x40] sm:$0xff] (!%p1259_p4)  ;;  %v411_v18 = vld [vmem:[%s2226_s2 + $0x50] sm:$0xff] (!%p1259_p4) }
  0x14   : > { %1269 = vmatpush1.bf16.msra.mxu0 (!%p1259_p4), %v1268_v9  ;;  %1410 = vmatpush1.bf16.msra.mxu1 (!%p1259_p4), %v1268_v9  ;;  %v1274_v16 = vpack.c.bf16 (!%p1259_p4), %v412_v14, %v410_v13  ;;  %v414_v19 = vld [vmem:[%s2226_s2 + $0x68] sm:$0xff] (!%p1259_p4)  ;;  %v416_v20 = vld [vmem:[%s2226_s2 + $0x78] sm:$0xff] (!%p1259_p4)  ;;  %v1276_v21 = vpack.c.bf16 (!%p1259_p4), %v411_v18, %v409_v17  ;;  %v413_v23 = vld [vmem:[%s2226_s2 + $0x60] sm:$0xff] (!%p1259_p4) }
  0x15   : > { %1271 = vmatprep.subr.bf16.mxu0 (!%p1259_p4), %v1270_v10  ;;  %1395 = vmatprep.subr.bf16.mxu1 (!%p1259_p4), %v1270_v10  ;;  %v1278_v22 = vpack.c.bf16 (!%p1259_p4), %v416_v20, %v414_v19  ;;  %v415_v24 = vld [vmem:[%s2226_s2 + $0x70] sm:$0xff] (!%p1259_p4)  ;;  %v418_v25 = vld [vmem:[%s2226_s2 + $0x88] sm:$0xff] (!%p1259_p4)  ;;  %v420_v26 = vld [vmem:[%s2226_s2 + $0x98] sm:$0xff] (!%p1259_p4) }
  0x16   : > { %v1280_v27 = vpack.c.bf16 (!%p1259_p4), %v415_v24, %v413_v23  ;;  %v1282_v28 = vpack.c.bf16 (!%p1259_p4), %v420_v26, %v418_v25  ;;  %v417_v29 = vld [vmem:[%s2226_s2 + $0x80] sm:$0xff] (!%p1259_p4)  ;;  %v419_v30 = vld [vmem:[%s2226_s2 + $0x90] sm:$0xff] (!%p1259_p4)  ;;  %v422_v31 = vld [vmem:[%s2226_s2 + $0xa8] sm:$0xff] (!%p1259_p4) }
  0x17   : > { %v424_v32 = vld [vmem:[%s2226_s2 + $0xb8] sm:$0xff]  ;;  %v1284_v33 = vpack.c.bf16 %v419_v30, %v417_v29  ;;  %v421_v35 = vld [vmem:[%s2226_s2 + $0xa0] sm:$0xff]  ;;  %v423_v36 = vld [vmem:[%s2226_s2 + $0xb0] sm:$0xff] }
  0x18   : > { %1273 = vmatpush1.bf16.msra.mxu0 %v1272_v15  ;;  %1411 = vmatpush1.bf16.msra.mxu1 %v1272_v15  ;;  %v1286_v34 = vpack.c.bf16 %v424_v32, %v422_v31  ;;  %v426_v37 = vld [vmem:[%s2226_s2 + $0xc8] sm:$0xff]  ;;  %v428_v38 = vld [vmem:[%s2226_s2 + $0xd8] sm:$0xff]  ;;  %v1288_v39 = vpack.c.bf16 %v423_v36, %v421_v35  ;;  %v425_v40 = vld [vmem:[%s2226_s2 + $0xc0] sm:$0xff] }
  0x19   : > { %1275 = vmatprep.subr.bf16.mxu0 %v1274_v16  ;;  %1396 = vmatprep.subr.bf16.mxu1 %v1274_v16  ;;  %v1290_v41 = vpack.c.bf16 %v428_v38, %v426_v37  ;;  %v427_v42 = vld [vmem:[%s2226_s2 + $0xd0] sm:$0xff]  ;;  %v390_v43 = vld [vmem:[%s2224_s0 + $0x8] sm:$0xff]  ;;  %v396_v44 = vld [vmem:[%s2224_s0 + $0x38] sm:$0xff] }
  0x1a   : > { %v430_v45 = vld [vmem:[%s2226_s2 + $0xe8] sm:$0xff]  ;;  %v432_v46 = vld [vmem:[%s2226_s2 + $0xf8] sm:$0xff]  ;;  %589 = vmatprep.mubr.f32.mxu0 %v390_v43  ;;  %607 = vmatprep.mubr.f32.mxu1 %v396_v44  ;;  %v1292_v47 = vpack.c.bf16 %v427_v42, %v425_v40  ;;  %v429_v48 = vld [vmem:[%s2226_s2 + $0xe0] sm:$0xff] }
  0x1b   : > { %v1294_v49 = vpack.c.bf16 %v432_v46, %v430_v45  ;;  %v431_v50 = vld [vmem:[%s2226_s2 + $0xf0] sm:$0xff]  ;;  %v466_v52 = vld [vmem:[%s2225_s1 + $0x8] sm:$0xff]  ;;  %v436_v54 = vld [vmem:[%s2226_s2 + $0x118] sm:$0xff] }
  0x1c   : > { %1277 = vmatpush1.bf16.msra.mxu0 %v1276_v21  ;;  %1412 = vmatpush1.bf16.msra.mxu1 %v1276_v21  ;;  %v467_v51 = vld [vmem:[%s2225_s1 + $0x10] sm:$0xff]  ;;  %v434_v53 = vld [vmem:[%s2226_s2 + $0x108] sm:$0xff]  ;;  %v1296_v55 = vpack.c.bf16 %v431_v50, %v429_v48  ;;  %v465_v56 = vld [vmem:[%s2225_s1] sm:$0xff] }
  0x1d   : > { %1279 = vmatprep.subr.bf16.mxu0 %v1278_v22  ;;  %1397 = vmatprep.subr.bf16.mxu1 %v1278_v22  ;;  %v1298_v57 = vpack.c.bf16 %v436_v54, %v434_v53  ;;  %v433_v58 = vld [vmem:[%s2226_s2 + $0x100] sm:$0xff]  ;;  %v435_v59 = vld [vmem:[%s2226_s2 + $0x110] sm:$0xff]  ;;  %v438_v60 = vld [vmem:[%s2226_s2 + $0x128] sm:$0xff]  ;;  %v1579_v54 = vmov 0.0  }
  0x1e   : > { %484 = vperm.xlu1 %1500, %v467_v51   ;;  %633 = vperm.xlu0 %1502, %v466_v52   ;;  %v440_v61 = vld [vmem:[%s2226_s2 + $0x138] sm:$0xff]  ;;  %v1300_v62 = vpack.c.bf16 %v435_v59, %v433_v58  ;;  %v437_v0 = vld [vmem:[%s2226_s2 + $0x120] sm:$0xff]  ;;  %v439_v1 = vld [vmem:[%s2226_s2 + $0x130] sm:$0xff] }
  0x1f   : > { %v1302_v63 = vpack.c.bf16 %v440_v61, %v438_v60  ;;  %v442_v2 = vld [vmem:[%s2226_s2 + $0x148] sm:$0xff]  ;;  %v444_v3 = vld [vmem:[%s2226_s2 + $0x158] sm:$0xff]  ;;  %v1304_v5 = vpack.c.bf16 %v439_v1, %v437_v0  ;;  %v469_v6 = vld [vmem:[%s2225_s1 + $0x20] sm:$0xff] }
  0x20   : > { %1281 = vmatpush1.bf16.msra.mxu0 %v1280_v27  ;;  %1413 = vmatpush1.bf16.msra.mxu1 %v1280_v27  ;;  %v468_v4 = vld [vmem:[%s2225_s1 + $0x18] sm:$0xff]  ;;  %v1306_v9 = vpack.c.bf16 %v444_v3, %v442_v2  ;;  %v441_v10 = vld [vmem:[%s2226_s2 + $0x140] sm:$0xff]  ;;  %v443_v11 = vld [vmem:[%s2226_s2 + $0x150] sm:$0xff] }
  0x21   : > { %1283 = vmatprep.subr.bf16.mxu0 %v1282_v28  ;;  %1398 = vmatprep.subr.bf16.mxu1 %v1282_v28  ;;  %v446_v12 = vld [vmem:[%s2226_s2 + $0x168] sm:$0xff]  ;;  %v448_v13 = vld [vmem:[%s2226_s2 + $0x178] sm:$0xff]  ;;  %v1308_v14 = vpack.c.bf16 %v443_v11, %v441_v10  ;;  %v445_v16 = vld [vmem:[%s2226_s2 + $0x160] sm:$0xff] }
  0x22   : > { %1501 = vset.pattern.permute.xlu1 %v1578_v8  ;;  %1503 = vset.pattern.permute.xlu0 %v1577_v7  ;;  %v1310_v15 = vpack.c.bf16 %v448_v13, %v446_v12  ;;  %v447_v17 = vld [vmem:[%s2226_s2 + $0x170] sm:$0xff]  ;;  %v450_v18 = vld [vmem:[%s2226_s2 + $0x188] sm:$0xff]  ;;  %v452_v19 = vld [vmem:[%s2226_s2 + $0x198] sm:$0xff] }
  0x23   : > { %629 = vperm.xlu1 %1501, %v465_v56   ;;  %474 = vperm.xlu0 %1503, %v465_v56   ;;  %v1312_v20 = vpack.c.bf16 %v447_v17, %v445_v16  ;;  %v1314_v21 = vpack.c.bf16 %v452_v19, %v450_v18  ;;  %v449_v22 = vld [vmem:[%s2226_s2 + $0x180] sm:$0xff]  ;;  %v451_v23 = vld [vmem:[%s2226_s2 + $0x190] sm:$0xff]  ;;  %v454_v24 = vld [vmem:[%s2226_s2 + $0x1a8] sm:$0xff] }
  0x24   : > { %1285 = vmatpush1.bf16.msra.mxu0 %v1284_v33  ;;  %1414 = vmatpush1.bf16.msra.mxu1 %v1284_v33  ;;  %v456_v25 = vld [vmem:[%s2226_s2 + $0x1b8] sm:$0xff]  ;;  %v1316_v26 = vpack.c.bf16 %v451_v23, %v449_v22  ;;  %v453_v28 = vld [vmem:[%s2226_s2 + $0x1a0] sm:$0xff]  ;;  %v455_v29 = vld [vmem:[%s2226_s2 + $0x1b0] sm:$0xff] }
  0x25   : > { %1287 = vmatprep.subr.bf16.mxu0 %v1286_v34  ;;  %1399 = vmatprep.subr.bf16.mxu1 %v1286_v34  ;;  %v1318_v27 = vpack.c.bf16 %v456_v25, %v454_v24  ;;  %v458_v30 = vld [vmem:[%s2226_s2 + $0x1c8] sm:$0xff]  ;;  %v460_v31 = vld [vmem:[%s2226_s2 + $0x1d8] sm:$0xff]  ;;  %v1320_v33 = vpack.c.bf16 %v455_v29, %v453_v28  ;;  %v457_v35 = vld [vmem:[%s2226_s2 + $0x1c0] sm:$0xff] }
  0x26   : > { %v470_v32 = vld [vmem:[%s2225_s1 + $0x28] sm:$0xff]  ;;  %v1322_v34 = vpack.c.bf16 %v460_v31, %v458_v30  ;;  %v459_v36 = vld [vmem:[%s2226_s2 + $0x1d0] sm:$0xff]  ;;  %v464_v37 = vld [vmem:[%s2226_s2 + $0x1f8] sm:$0xff] }
  0x27   : > { %1504 = vset.pattern.permute.xlu1 %v1577_v7  ;;  %479 = vperm.xlu0 %1503, %v466_v52   ;;  %v1324_v38 = vpack.c.bf16 %v459_v36, %v457_v35  ;;  %v461_v40 = vld [vmem:[%s2226_s2 + $0x1e0] sm:$0xff]  ;;  %v395_v44 = vld [vmem:[%s2224_s0 + $0x30] sm:$0xff]  ;;  %v398_v45 = vld [vmem:[%s2224_s0 + $0x48] sm:$0xff]  ;;  %v383_v52 = vlaneseq }
  0x28   : > { %1289 = vmatpush1.bf16.msra.mxu0 %v1288_v39  ;;  %1415 = vmatpush1.bf16.msra.mxu1 %v1288_v39  ;;  %v389_v43 = vld [vmem:[%s2224_s0] sm:$0xff]  ;;  %v391_v46 = vld [vmem:[%s2224_s0 + $0x10] sm:$0xff]  ;;  %v394_v48 = vld [vmem:[%s2224_s0 + $0x28] sm:$0xff] }
  0x29   : > { %1291 = vmatprep.subr.bf16.mxu0 %v1290_v41  ;;  %1400 = vmatprep.subr.bf16.mxu1 %v1290_v41  ;;  %v463_v41 = vld [vmem:[%s2226_s2 + $0x1f0] sm:$0xff]  ;;  %v393_v50 = vld [vmem:[%s2224_s0 + $0x20] sm:$0xff]  ;;  %vm1907_vm0 = vcmp.lt.s32.totalorder %v383_v52, 256  ;;  %v1915_v60 = vshrl.u32 %v383_v52, 7 }
  0x2a   : > { %489 = vperm.xlu1 %1504, %v468_v4   ;;  %v1328_v42 = vpack.c.bf16 %v463_v41, %v461_v40  ;;  %387 = vst.msk [vmem:[#allocation3] sm:$0x3] %vm1907_vm0, %v1579_v54  ;;  %388 = vst.msk [vmem:[#allocation4] sm:$0x3] %vm1907_vm0, %v1579_v54 }
  0x2b   : > { %494 = vperm.xlu0 %1503, %v469_v6   ;;  %v471_v0 = vld [vmem:[%s2227_s3] ss:$2 sm:$0x3]  ;;  %v509_v1 = vsub.s32 1, %v1915_v60 }
  0x2c   : > { %1293 = vmatpush1.bf16.msra.mxu0 %v1292_v47  ;;  %1416 = vmatpush1.bf16.msra.mxu1 %v1292_v47  ;;  %v397_v47 = vld [vmem:[%s2224_s0 + $0x40] sm:$0xff] }
  0x2d   : > { %1295 = vmatprep.subr.bf16.mxu0 %v1294_v49  ;;  %1401 = vmatprep.subr.bf16.mxu1 %v1294_v49  ;;  %v400_v49 = vld [vmem:[%s2224_s0 + $0x58] sm:$0xff] }
  0x2e   : > { %1505 = vset.pattern.permute.xlu1 %v1578_v8 }
  0x2f   : > { %637 = vperm.xlu1 %1505, %v467_v51   ;;  %1507 = vset.pattern.permute.xlu0 %v1578_v8  ;;  %v399_v51 = vld [vmem:[%s2224_s0 + $0x50] sm:$0xff] }
  0x30   : > { %1297 = vmatpush1.bf16.msra.mxu0 %v1296_v55  ;;  %1417 = vmatpush1.bf16.msra.mxu1 %v1296_v55 }
  0x31   : > { %1299 = vmatprep.subr.bf16.mxu0 %v1298_v57  ;;  %1402 = vmatprep.subr.bf16.mxu1 %v1298_v57 }
  0x32   : > { %645 = vperm.xlu0 %1507, %v469_v6   ;;  %v510_v6 = vrot.slane %v471_v0, %v509_v1 }
  0x33   : > { %641 = vperm.xlu1 %1505, %v468_v4   ;;  %v1260_v4 = vld [vmem:[%s2227_s3 + $0x1] ss:$2 sm:$0x3] }
  0x34   : > { %1301 = vmatpush1.bf16.msra.mxu0 %v1300_v62  ;;  %1418 = vmatpush1.bf16.msra.mxu1 %v1300_v62  ;;  %v660_v10 = vrot.slane %v1260_v4, %v509_v1 }
  0x35   : > { %1303 = vmatprep.subr.bf16.mxu0 %v1302_v63  ;;  %1403 = vmatprep.subr.bf16.mxu1 %v1302_v63  ;;  %v505_v63 = vsub.s32 0, %v1915_v60 }
  0x37   : > { %1506 = vset.pattern.permute.xlu1 %v1577_v7  ;;  %v462_v7 = vld [vmem:[%s2226_s2 + $0x1e8] sm:$0xff] }
  0x38   : > { %1305 = vmatpush1.bf16.msra.mxu0 %v1304_v5  ;;  %1419 = vmatpush1.bf16.msra.mxu1 %v1304_v5  ;;  %v1326_v39 = vpack.c.bf16 %v464_v37, %v462_v7  ;;  %v506_v5 = vrot.slane %v471_v0, %v505_v63 }
  0x39   : > { %1307 = vmatprep.subr.bf16.mxu0 %v1306_v9  ;;  %1404 = vmatprep.subr.bf16.mxu1 %v1306_v9  ;;  %v656_v9 = vrot.slane %v1260_v4, %v505_v63 }
  0x3a   : > { %499 = vperm.xlu1 %1506, %v470_v32  }
  0x3c   : > { %1309 = vmatpush1.bf16.msra.mxu0 %v1308_v14  ;;  %1420 = vmatpush1.bf16.msra.mxu1 %v1308_v14 }
  0x3d   : > { %1311 = vmatprep.subr.bf16.mxu0 %v1310_v15  ;;  %1405 = vmatprep.subr.bf16.mxu1 %v1310_v15 }
  0x3e   : > { %1508 = vset.pattern.permute.xlu1 %v1578_v8  ;;  %v392_v8 = vld [vmem:[%s2224_s0 + $0x18] sm:$0xff] }
  0x3f   : > { %649 = vperm.xlu1 %1508, %v470_v32  }
  0x40   : > { %1313 = vmatpush1.bf16.msra.mxu0 %v1312_v20  ;;  %1421 = vmatpush1.bf16.msra.mxu1 %v1312_v20 }
  0x41   : > { %1315 = vmatprep.subr.bf16.mxu0 %v1314_v21  ;;  %1406 = vmatprep.subr.bf16.mxu1 %v1314_v21 }
  0x44   : > { %1317 = vmatpush1.bf16.msra.mxu0 %v1316_v26  ;;  %1422 = vmatpush1.bf16.msra.mxu1 %v1316_v26 }
  0x45   : > { %1319 = vmatprep.subr.bf16.mxu0 %v1318_v27  ;;  %1407 = vmatprep.subr.bf16.mxu1 %v1318_v27 }
  0x48   : > { %1321 = vmatpush1.bf16.msra.mxu0 %v1320_v33  ;;  %1423 = vmatpush1.bf16.msra.mxu1 %v1320_v33 }
  0x49   : > { %1323 = vmatprep.subr.bf16.mxu0 %v1322_v34  ;;  %1408 = vmatprep.subr.bf16.mxu1 %v1322_v34 }
  0x4c   : > { %1325 = vmatpush1.bf16.msra.mxu0 %v1324_v38  ;;  %1424 = vmatpush1.bf16.msra.mxu1 %v1324_v38 }
  0x4d   : > { %1327 = vmatprep.subr.bf16.mxu0 %v1326_v39  ;;  %1409 = vmatprep.subr.bf16.mxu1 %v1326_v39 }
  0x50   : > { %1329 = vmatpush1.bf16.msra.mxu0 %v1328_v42  ;;  %1425 = vmatpush1.bf16.msra.mxu1 %v1328_v42 }
  0x53   : > { %590 = vmatmul.mubr.f32.vlgmr.msra.gmra.mrb[0].mxu0 %v389_v43  ;;  %608 = vmatmul.mubr.f32.vlgmr.msra.gmra.mrb[0].mxu1 %v395_v44 }
  0x54   : > { %595 = vmatprep.mubr.f32.mxu0 %v392_v8  ;;  %613 = vmatprep.mubr.f32.mxu1 %v398_v45 }
  0x57   : > { %596 = vmatmul.mubr.f32.gmra.mrb[2].mxu0 %v391_v46  ;;  %614 = vmatmul.mubr.f32.gmra.mrb[2].mxu1 %v397_v47 }
  0x58   : > { %601 = vmatprep.mubr.f32.mxu0 %v394_v48  ;;  %619 = vmatprep.mubr.f32.mxu1 %v400_v49 }
  0x5b   : > { %602 = vmatmul.mubr.f32.gmra.mrb[4].mxu0 %v393_v50  ;;  %620 = vmatmul.mubr.f32.gmra.mrb[4].mxu1 %v399_v51 }
  0x9d   : > { %v485_v55 = vpop.permute.xlu1 %484  ;;  %v634_v56 = vpop.permute.xlu0 %633 }
  0x9e   : > { %v517_v17 = vmul.f32 %v506_v5, %v485_v55  ;;  %v1925_v18 = vmul.f32 %v510_v6, %v485_v55  ;;  %v665_v43 = vmul.f32 %v656_v9, %v634_v56  ;;  %v666_v44 = vmul.f32 %v660_v10, %v634_v56 }
  0xa2   : > { %v630_v57 = vpop.permute.xlu1 %629  ;;  %v475_v58 = vpop.permute.xlu0 %474 }
  0xa3   : > { %v513_v11 = vmul.f32 %v506_v5, %v475_v58  ;;  %v514_v13 = vmul.f32 %v510_v6, %v475_v58  ;;  %v663_v23 = vmul.f32 %v656_v9, %v630_v57  ;;  %v664_v24 = vmul.f32 %v660_v10, %v630_v57 }
  0xa6   : > { %v480_v61 = vpop.permute.xlu0 %479 }
  0xa7   : > { %v515_v29 = vmul.f32 %v506_v5, %v480_v61  ;;  %v516_v30 = vmul.f32 %v510_v6, %v480_v61 }
  0xa9   : > { %v490_v59 = vpop.permute.xlu1 %489 }
  0xaa   : > { %v495_v2 = vpop.permute.xlu0 %494  ;;  %v519_v14 = vmul.f32 %v506_v5, %v490_v59  ;;  %v520_v19 = vmul.f32 %v510_v6, %v490_v59 }
  0xab   : > { %v521_v33 = vmul.f32 %v506_v5, %v495_v2  ;;  %v522_v37 = vmul.f32 %v510_v6, %v495_v2 }
  0xae   : > { %v638_v62 = vpop.permute.xlu1 %637 }
  0xaf   : > { %v667_v48 = vmul.f32 %v656_v9, %v638_v62  ;;  %v668_v49 = vmul.f32 %v660_v10, %v638_v62 }
  0xb1   : > { %v646_v16 = vpop.permute.xlu0 %645 }
  0xb2   : > { %v642_v3 = vpop.permute.xlu1 %641  ;;  %v671_v36 = vmul.f32 %v656_v9, %v646_v16  ;;  %v672_v40 = vmul.f32 %v660_v10, %v646_v16 }
  0xb3   : > { %v669_v15 = vmul.f32 %v656_v9, %v642_v3  ;;  %v670_v20 = vmul.f32 %v660_v10, %v642_v3 }
  0xb9   : > { %v500_v12 = vpop.permute.xlu1 %499 }
  0xba   : > { %v523_v55 = vmul.f32 %v506_v5, %v500_v12  ;;  %v524_v57 = vmul.f32 %v510_v6, %v500_v12 }
  0xbe   : > { %v650_v7 = vpop.permute.xlu1 %649 }
  0xbf   : > { %v673_v63 = vmul.f32 %v656_v9, %v650_v7  ;;  %v674_v0 = vmul.f32 %v660_v10, %v650_v7 }
 0x126   : > { %v591_v21 = vpop.f32.mrb[0].mxu0  ;;  %v609_v22 = vpop.f32.mrb[0].mxu1 }
 0x127   : > { %v592_v25 = vadd.f32 %v591_v21, %v513_v11  ;;  %v610_v26 = vadd.f32 %v609_v22, %v519_v14  ;;  %v593_v27 = vpop.f32.mrb[1].mxu0  ;;  %v611_v28 = vpop.f32.mrb[1].mxu1 }
 0x128   : > { %v594_v31 = vadd.f32 %v593_v27, %v514_v13  ;;  %v612_v32 = vadd.f32 %v611_v28, %v520_v19 }
 0x129   : > { %v675_v34 = vadd.f32 %v663_v23, %v592_v25  ;;  %v681_v35 = vadd.f32 %v669_v15, %v610_v26 }
 0x12a   : > { %v676_v38 = vadd.f32 %v664_v24, %v594_v31  ;;  %v682_v39 = vadd.f32 %v670_v20, %v612_v32  ;;  %v597_v41 = vpop.f32.mrb[2].mxu0  ;;  %v615_v42 = vpop.f32.mrb[2].mxu1 }
 0x12b   : > { %690 = vst [vmem:[#allocation2] sm:$0xff] %v675_v34  ;;  %696 = vst [vmem:[#allocation2 + $0x30] sm:$0xff] %v681_v35  ;;  %v598_v8 = vadd.f32 %v597_v41, %v515_v29  ;;  %v616_v45 = vadd.f32 %v615_v42, %v521_v33  ;;  %v599_v46 = vpop.f32.mrb[3].mxu0  ;;  %v617_v47 = vpop.f32.mrb[3].mxu1  ;;  %v750_v1 = vmul.f32 %v675_v34, %v675_v34 }
 0x12c   : > { %691 = vst [vmem:[#allocation2 + $0x8] sm:$0xff] %v676_v38  ;;  %697 = vst [vmem:[#allocation2 + $0x38] sm:$0xff] %v682_v39  ;;  %v600_v50 = vadd.f32 %v599_v46, %v516_v30  ;;  %v618_v51 = vadd.f32 %v617_v47, %v522_v37  ;;  %v751_v13 = vmul.f32 %v676_v38, %v676_v38  ;;  %v1580_v47 = vmov 1966171168  }
 0x12d   : > { %v677_v52 = vadd.f32 %v665_v43, %v598_v8  ;;  %v683_v54 = vadd.f32 %v671_v36, %v616_v45  ;;  %v756_v25 = vmul.f32 %v681_v35, %v681_v35 }
 0x12e   : > { %v678_v58 = vadd.f32 %v666_v44, %v600_v50  ;;  %v684_v59 = vadd.f32 %v672_v40, %v618_v51  ;;  %v603_v61 = vpop.f32.mrb[4].mxu0  ;;  %v621_v56 = vpop.f32.mrb[4].mxu1 }
 0x12f   : > { %692 = vst [vmem:[#allocation2 + $0x10] sm:$0xff] %v677_v52  ;;  %v703_v2 = vadd.f32 %v677_v52, %v675_v34  ;;  %v752_v3 = vmul.f32 %v677_v52, %v677_v52  ;;  %698 = vst [vmem:[#allocation2 + $0x40] sm:$0xff] %v683_v54  ;;  %v604_v62 = vadd.f32 %v603_v61, %v517_v17  ;;  %v605_v4 = vpop.f32.mrb[5].mxu0  ;;  %v623_v11 = vpop.f32.mrb[5].mxu1 }
 0x130   : > { %693 = vst [vmem:[#allocation2 + $0x18] sm:$0xff] %v678_v58  ;;  %v714_v14 = vadd.f32 %v678_v58, %v676_v38  ;;  %v753_v15 = vmul.f32 %v678_v58, %v678_v58  ;;  %699 = vst [vmem:[#allocation2 + $0x48] sm:$0xff] %v684_v59  ;;  %v606_v5 = vadd.f32 %v605_v4, %v1925_v18 }
 0x131   : > { %v762_v6 = vadd.f32 %v752_v3, %v750_v1  ;;  %v679_v12 = vadd.f32 %v667_v48, %v604_v62  ;;  %v622_v16 = vadd.f32 %v621_v56, %v523_v55  ;;  %v624_v9 = vadd.f32 %v623_v11, %v524_v57 }
 0x132   : > { %v773_v10 = vadd.f32 %v753_v15, %v751_v13  ;;  %v680_v19 = vadd.f32 %v668_v49, %v606_v5  ;;  %v757_v18 = vmul.f32 %v682_v39, %v682_v39  ;;  %v758_v30 = vmul.f32 %v683_v54, %v683_v54 }
 0x133   : > { %694 = vst [vmem:[#allocation2 + $0x20] sm:$0xff] %v679_v12  ;;  %v704_v20 = vadd.f32 %v703_v2, %v679_v12  ;;  %v754_v21 = vmul.f32 %v679_v12, %v679_v12  ;;  %v685_v22 = vadd.f32 %v673_v63, %v622_v16  ;;  %v686_v17 = vadd.f32 %v674_v0, %v624_v9  ;;  %v702_v12 = vld [vmem:[#allocation3] sm:$0x3] }
 0x134   : > { %695 = vst [vmem:[#allocation2 + $0x28] sm:$0xff] %v680_v19  ;;  %v715_v23 = vadd.f32 %v714_v14, %v680_v19  ;;  %v755_v24 = vmul.f32 %v680_v19, %v680_v19  ;;  %v759_v33 = vmul.f32 %v684_v59, %v684_v59  ;;  %v729_v48 = vunpack.c.l.s4 %v1580_v47 }
 0x135   : > { %v705_v26 = vadd.f32 %v704_v20, %v681_v35  ;;  %v763_v27 = vadd.f32 %v762_v6, %v754_v21  ;;  %700 = vst [vmem:[#allocation2 + $0x50] sm:$0xff] %v685_v22  ;;  %701 = vst [vmem:[#allocation2 + $0x58] sm:$0xff] %v686_v17  ;;  %v760_v37 = vmul.f32 %v685_v22, %v685_v22 }
 0x136   : > { %v716_v28 = vadd.f32 %v715_v23, %v682_v39  ;;  %v774_v29 = vadd.f32 %v773_v10, %v755_v24  ;;  %v761_v41 = vmul.f32 %v686_v17, %v686_v17  ;;  %v749_v10 = vld [vmem:[#allocation4] sm:$0x3] }
 0x137   : > { %v764_v31 = vadd.f32 %v763_v27, %v756_v25  ;;  %v706_v32 = vadd.f32 %v705_v26, %v683_v54 }
 0x138   : > { %v775_v34 = vadd.f32 %v774_v29, %v757_v18  ;;  %v717_v36 = vadd.f32 %v716_v28, %v684_v59  ;;  %v730_v59 = vunpack.c.0.s8 %v729_v48 }
 0x139   : > { %v707_v7 = vadd.f32 %v706_v32, %v685_v22  ;;  %v765_v38 = vadd.f32 %v764_v31, %v758_v30 }
 0x13a   : > { %v718_v40 = vadd.f32 %v717_v36, %v686_v17  ;;  %v776_v42 = vadd.f32 %v775_v34, %v759_v33  ;;  %v733_v4 = vsub.s32 %v730_v59, %v1915_v60 }
 0x13b   : > { %v708_v43 = vrot.slane %v707_v7, 4  ;;  %v766_v35 = vadd.f32 %v765_v38, %v760_v37 }
 0x13c   : > { %v719_v44 = vrot.slane %v718_v40, 4  ;;  %v777_v8 = vadd.f32 %v776_v42, %v761_v41 }
 0x13d   : > { %v709_v45 = vadd.f32 %v708_v43, %v707_v7  ;;  %v767_v46 = vrot.slane %v766_v35, 4 }
 0x13e   : > { %v720_v39 = vadd.f32 %v719_v44, %v718_v40  ;;  %v778_v49 = vrot.slane %v777_v8, 4 }
 0x13f   : > { %v710_v50 = vrot.slane %v709_v45, 2  ;;  %v768_v51 = vadd.f32 %v767_v46, %v766_v35 }
 0x140   : > { %v721_v52 = vrot.slane %v720_v39, 2  ;;  %v779_v54 = vadd.f32 %v778_v49, %v777_v8 }
 0x141   : > { %v711_v55 = vadd.f32 %v710_v50, %v709_v45  ;;  %v769_v57 = vrot.slane %v768_v51, 2 }
 0x142   : > { %v722_v58 = vadd.f32 %v721_v52, %v720_v39  ;;  %v780_v61 = vrot.slane %v779_v54, 2 }
 0x143   : > { %v712_v56 = vrot.slane %v711_v55, 1  ;;  %v770_v63 = vadd.f32 %v769_v57, %v768_v51 }
 0x144   : > { %v723_v0 = vrot.slane %v722_v58, 1  ;;  %v781_v1 = vadd.f32 %v780_v61, %v779_v54 }
 0x145   : > { %v713_v2 = vadd.f32 %v712_v56, %v711_v55  ;;  %v771_v3 = vrot.slane %v770_v63, 1 }
 0x146   : > { %v724_v62 = vadd.f32 %v723_v0, %v722_v58  ;;  %v782_v11 = vrot.slane %v781_v1, 1 }
 0x147   : > { %v772_v13 = vadd.f32 %v771_v3, %v770_v63 }
 0x148   : > { %v727_v14 = vcombine.low %v713_v2, %v724_v62  ;;  %v783_v15 = vadd.f32 %v782_v11, %v781_v1 }
 0x14a   : > { %v734_v5 = vrot.slane %v727_v14, %v733_v4  ;;  %v786_v6 = vcombine.low %v772_v13, %v783_v15 }
 0x14c   : > { %v741_v16 = vrot.slane %v734_v5, %v733_v4  ;;  %v793_v9 = vrot.slane %v786_v6, %v733_v4 }
 0x14e   : > { %v743_v19 = vadd.f32 %v741_v16, %v702_v12  ;;  %v800_v20 = vrot.slane %v793_v9, %v733_v4 }
 0x150   : > { %748 = vst.msk [vmem:[#allocation3] sm:$0x3] %vm1907_vm0, %v743_v19  ;;  %v802_v21 = vadd.f32 %v800_v20, %v749_v10 }
 0x152   : > { %803 = vst.msk [vmem:[#allocation4] sm:$0x3] %vm1907_vm0, %v802_v21 }
 0x153 PF: > { %p1261_p5 = scmp.ne.s32.totalorder %s1567_s27, 1 }
 0x154   : > { %v908_v60 = vld [vmem:[%s2230_s6 + $0x8] sm:$0xff] (!%p1261_p5)  ;;  %v910_v22 = vld [vmem:[%s2230_s6 + $0x18] sm:$0xff] (!%p1261_p5)  ;;  %v907_v17 = vld [vmem:[%s2230_s6] sm:$0xff] (!%p1261_p5) }
 0x155   : > { %807 = sbr.rel (%p1261_p5) target bundleno = 796 (0x31c), region = 64  ;;  %v1330_v23 = vpack.c.bf16 (!%p1261_p5), %v910_v22, %v908_v60  ;;  %v909_v53 = vld [vmem:[%s2230_s6 + $0x10] sm:$0xff] (!%p1261_p5)  ;;  %v912_v24 = vld [vmem:[%s2230_s6 + $0x28] sm:$0xff] (!%p1261_p5)  ;;  %v914_v25 = vld [vmem:[%s2230_s6 + $0x38] sm:$0xff] (!%p1261_p5) }
 0x156   : > { %v1332_v26 = vpack.c.bf16 (!%p1261_p5), %v909_v53, %v907_v17  ;;  %v1334_v27 = vpack.c.bf16 (!%p1261_p5), %v914_v25, %v912_v24  ;;  %v911_v18 = vld [vmem:[%s2230_s6 + $0x20] sm:$0xff] (!%p1261_p5)  ;;  %v913_v28 = vld [vmem:[%s2230_s6 + $0x30] sm:$0xff] (!%p1261_p5)  ;;  %v916_v29 = vld [vmem:[%s2230_s6 + $0x48] sm:$0xff] (!%p1261_p5) }
 0x157   : > { %1331 = vmatprep.subr.bf16.mxu0 (!%p1261_p5), %v1330_v23  ;;  %1426 = vmatprep.subr.bf16.mxu1 (!%p1261_p5), %v1330_v23  ;;  %v918_v30 = vld [vmem:[%s2230_s6 + $0x58] sm:$0xff] (!%p1261_p5)  ;;  %v1336_v31 = vpack.c.bf16 (!%p1261_p5), %v913_v28, %v911_v18  ;;  %v915_v33 = vld [vmem:[%s2230_s6 + $0x40] sm:$0xff] (!%p1261_p5)  ;;  %v917_v34 = vld [vmem:[%s2230_s6 + $0x50] sm:$0xff] (!%p1261_p5) }
 0x158   : > { %1333 = vmatpush1.bf16.msra.mxu0 (!%p1261_p5), %v1332_v26  ;;  %1442 = vmatpush1.bf16.msra.mxu1 (!%p1261_p5), %v1332_v26  ;;  %v1338_v32 = vpack.c.bf16 (!%p1261_p5), %v918_v30, %v916_v29  ;;  %v920_v36 = vld [vmem:[%s2230_s6 + $0x68] sm:$0xff] (!%p1261_p5)  ;;  %v922_v7 = vld [vmem:[%s2230_s6 + $0x78] sm:$0xff] (!%p1261_p5)  ;;  %v1340_v37 = vpack.c.bf16 (!%p1261_p5), %v917_v34, %v915_v33  ;;  %v919_v40 = vld [vmem:[%s2230_s6 + $0x60] sm:$0xff] (!%p1261_p5)  ;;  %v823_v29 = vlaneseq (!%p1261_p5) }
 0x159   : > { %1335 = vmatprep.subr.bf16.mxu0 (!%p1261_p5), %v1334_v27  ;;  %1427 = vmatprep.subr.bf16.mxu1 (!%p1261_p5), %v1334_v27  ;;  %v1342_v38 = vpack.c.bf16 (!%p1261_p5), %v922_v7, %v920_v36  ;;  %v921_v41 = vld [vmem:[%s2230_s6 + $0x70] sm:$0xff] (!%p1261_p5)  ;;  %v924_v42 = vld [vmem:[%s2230_s6 + $0x88] sm:$0xff] (!%p1261_p5)  ;;  %v926_v43 = vld [vmem:[%s2230_s6 + $0x98] sm:$0xff] (!%p1261_p5) }
 0x15a   : > { %v1344_v35 = vpack.c.bf16 (!%p1261_p5), %v921_v41, %v919_v40  ;;  %v1346_v44 = vpack.c.bf16 (!%p1261_p5), %v926_v43, %v924_v42  ;;  %v923_v8 = vld [vmem:[%s2230_s6 + $0x80] sm:$0xff] (!%p1261_p5)  ;;  %v925_v45 = vld [vmem:[%s2230_s6 + $0x90] sm:$0xff] (!%p1261_p5)  ;;  %v928_v46 = vld [vmem:[%s2230_s6 + $0xa8] sm:$0xff] (!%p1261_p5)  ;;  %vm2091_vm1 = vcmp.lt.s32.totalorder (!%p1261_p5), %v823_v29, 256 }
 0x15b   : > { %v930_v39 = vld [vmem:[%s2230_s6 + $0xb8] sm:$0xff] (!%p1261_p5)  ;;  %v1348_v47 = vpack.c.bf16 (!%p1261_p5), %v925_v45, %v923_v8  ;;  %v927_v49 = vld [vmem:[%s2230_s6 + $0xa0] sm:$0xff] (!%p1261_p5)  ;;  %v929_v50 = vld [vmem:[%s2230_s6 + $0xb0] sm:$0xff] (!%p1261_p5)  ;;  %v850_v45 = vshrl.u32 (!%p1261_p5), %v823_v29, 7 }
 0x15c   : > { %1337 = vmatpush1.bf16.msra.mxu0 %v1336_v31  ;;  %1443 = vmatpush1.bf16.msra.mxu1 %v1336_v31  ;;  %v1350_v48 = vpack.c.bf16 %v930_v39, %v928_v46  ;;  %v932_v51 = vld [vmem:[%s2230_s6 + $0xc8] sm:$0xff]  ;;  %v934_v52 = vld [vmem:[%s2230_s6 + $0xd8] sm:$0xff]  ;;  %v1352_v54 = vpack.c.bf16 %v929_v50, %v927_v49  ;;  %v931_v55 = vld [vmem:[%s2230_s6 + $0xc0] sm:$0xff] }
 0x15d   : > { %1339 = vmatprep.subr.bf16.mxu0 %v1338_v32  ;;  %1428 = vmatprep.subr.bf16.mxu1 %v1338_v32  ;;  %v1354_v57 = vpack.c.bf16 %v934_v52, %v932_v51  ;;  %v933_v58 = vld [vmem:[%s2230_s6 + $0xd0] sm:$0xff]  ;;  %v812_v59 = vld [vmem:[#allocation3] sm:$0x3]  ;;  %v814_v61 = vld [vmem:[#allocation4] sm:$0x3]  ;;  %v2121_v52 = vsub.s32 0, %v850_v45 }
 0x15e   : > { %v936_v56 = vld [vmem:[%s2230_s6 + $0xe8] sm:$0xff]  ;;  %v938_v63 = vld [vmem:[%s2230_s6 + $0xf8] sm:$0xff]  ;;  %v2024_v0 = vmul.f32 0.022727273, %v812_v59  ;;  %v815_v1 = vmul.f32 0.022727273, %v814_v61  ;;  %v1356_v2 = vpack.c.bf16 %v933_v58, %v931_v55 }
 0x15f   : > { %v1358_v62 = vpack.c.bf16 %v938_v63, %v936_v56  ;;  %v935_v4 = vld [vmem:[%s2230_s6 + $0xe0] sm:$0xff]  ;;  %v937_v11 = vld [vmem:[%s2230_s6 + $0xf0] sm:$0xff]  ;;  %v940_v13 = vld [vmem:[%s2230_s6 + $0x108] sm:$0xff] }
 0x160   : > { %1341 = vmatpush1.bf16.msra.mxu0 %v1340_v37  ;;  %1444 = vmatpush1.bf16.msra.mxu1 %v1340_v37  ;;  %v816_v3 = vmul.f32 %v2024_v0, %v2024_v0  ;;  %v942_v14 = vld [vmem:[%s2230_s6 + $0x118] sm:$0xff]  ;;  %v1360_v5 = vpack.c.bf16 %v937_v11, %v935_v4  ;;  %v939_v16 = vld [vmem:[%s2230_s6 + $0x100] sm:$0xff]  ;;  %v941_v9 = vld [vmem:[%s2230_s6 + $0x110] sm:$0xff] }
 0x161   : > { %1343 = vmatprep.subr.bf16.mxu0 %v1342_v38  ;;  %1429 = vmatprep.subr.bf16.mxu1 %v1342_v38  ;;  %v1362_v12 = vpack.c.bf16 %v942_v14, %v940_v13  ;;  %v944_v10 = vld [vmem:[%s2230_s6 + $0x128] sm:$0xff]  ;;  %v946_v19 = vld [vmem:[%s2230_s6 + $0x138] sm:$0xff]  ;;  %v1364_v21 = vpack.c.bf16 %v941_v9, %v939_v16  ;;  %v943_v22 = vld [vmem:[%s2230_s6 + $0x120] sm:$0xff] }
 0x162   : > { %v817_v15 = vsub.f32 %v815_v1, %v816_v3  ;;  %v1366_v60 = vpack.c.bf16 %v946_v19, %v944_v10  ;;  %v945_v17 = vld [vmem:[%s2230_s6 + $0x130] sm:$0xff]  ;;  %v948_v23 = vld [vmem:[%s2230_s6 + $0x148] sm:$0xff]  ;;  %v950_v53 = vld [vmem:[%s2230_s6 + $0x158] sm:$0xff] }
 0x163   : > { %v1368_v24 = vpack.c.bf16 %v945_v17, %v943_v22  ;;  %v1370_v25 = vpack.c.bf16 %v950_v53, %v948_v23  ;;  %v947_v26 = vld [vmem:[%s2230_s6 + $0x140] sm:$0xff]  ;;  %v949_v27 = vld [vmem:[%s2230_s6 + $0x150] sm:$0xff]  ;;  %v952_v18 = vld [vmem:[%s2230_s6 + $0x168] sm:$0xff] }
 0x164   : > { %1345 = vmatpush1.bf16.msra.mxu0 %v1344_v35  ;;  %1445 = vmatpush1.bf16.msra.mxu1 %v1344_v35  ;;  %v818_v6 = vmax.f32 %v817_v15, 0.0  ;;  %v954_v28 = vld [vmem:[%s2230_s6 + $0x178] sm:$0xff]  ;;  %v1372_v30 = vpack.c.bf16 %v949_v27, %v947_v26  ;;  %v819_v31 = vld [vmem:[%s2228_s4] sm:$0x3]  ;;  %v953_v34 = vld [vmem:[%s2230_s6 + $0x170] sm:$0xff] }
 0x165   : > { %1347 = vmatprep.subr.bf16.mxu0 %v1346_v44  ;;  %1430 = vmatprep.subr.bf16.mxu1 %v1346_v44  ;;  %v1374_v32 = vpack.c.bf16 %v954_v28, %v952_v18  ;;  %v951_v33 = vld [vmem:[%s2230_s6 + $0x160] sm:$0xff]  ;;  %v956_v7 = vld [vmem:[%s2230_s6 + $0x188] sm:$0xff]  ;;  %v958_v37 = vld [vmem:[%s2230_s6 + $0x198] sm:$0xff] }
 0x166   : > { %v820_v20 = vadd.f32 1e-05, %v818_v6  ;;  %v1376_v41 = vpack.c.bf16 %v953_v34, %v951_v33  ;;  %v828_v42 = vld [vmem:[%s2229_s5] sm:$0x3]  ;;  %v1378_v43 = vpack.c.bf16 %v958_v37, %v956_v7  ;;  %v957_v44 = vld [vmem:[%s2230_s6 + $0x190] sm:$0xff]  ;;  %v960_v46 = vld [vmem:[%s2230_s6 + $0x1a8] sm:$0xff] }
 0x167   : > { %v955_v35 = vld [vmem:[%s2230_s6 + $0x180] sm:$0xff]  ;;  %v962_v39 = vld [vmem:[%s2230_s6 + $0x1b8] sm:$0xff]  ;;  %v961_v51 = vld [vmem:[%s2230_s6 + $0x1b0] sm:$0xff] }
 0x168   : > { %1349 = vmatpush1.bf16.msra.mxu0 %v1348_v47  ;;  %1446 = vmatpush1.bf16.msra.mxu1 %v1348_v47  ;;  %1509 = vrsqrt.f32 %v820_v20  ;;  %v1382_v49 = vpack.c.bf16 %v962_v39, %v960_v46  ;;  %v959_v50 = vld [vmem:[%s2230_s6 + $0x1a0] sm:$0xff]  ;;  %v964_v55 = vld [vmem:[%s2230_s6 + $0x1c8] sm:$0xff]  ;;  %v965_v59 = vld [vmem:[%s2230_s6 + $0x1d0] sm:$0xff] }
 0x169   : > { %1351 = vmatprep.subr.bf16.mxu0 %v1350_v48  ;;  %1431 = vmatprep.subr.bf16.mxu1 %v1350_v48  ;;  %v1380_v48 = vpack.c.bf16 %v957_v44, %v955_v35  ;;  %v963_v58 = vld [vmem:[%s2230_s6 + $0x1c0] sm:$0xff]  ;;  %v836_v61 = vld [vmem:[#allocation2 + $0x8] sm:$0xff]  ;;  %v842_v56 = vld [vmem:[#allocation2 + $0x38] sm:$0xff]  ;;  %v1384_v63 = vpack.c.bf16 %v961_v51, %v959_v50 }
 0x16a   : > { %v835_v1 = vld [vmem:[#allocation2] sm:$0xff]  ;;  %v838_v13 = vld [vmem:[#allocation2 + $0x18] sm:$0xff]  ;;  %v844_v14 = vld [vmem:[#allocation2 + $0x48] sm:$0xff] }
 0x16b   : > { %v970_v15 = vld [vmem:[%s2230_s6 + $0x1f8] sm:$0xff]  ;;  %v969_v6 = vld [vmem:[%s2230_s6 + $0x1f0] sm:$0xff]  ;;  %v840_v20 = vld [vmem:[#allocation2 + $0x28] sm:$0xff] }
 0x16c   : > { %1353 = vmatpush1.bf16.msra.mxu0 %v1352_v54  ;;  %1447 = vmatpush1.bf16.msra.mxu1 %v1352_v54  ;;  %v2123_v54 = vsub.s32 1, %v850_v45  ;;  %v837_v19 = vld [vmem:[#allocation2 + $0x10] sm:$0xff]  ;;  %v846_v26 = vld [vmem:[#allocation2 + $0x58] sm:$0xff]  ;;  %v839_v34 = vld [vmem:[#allocation2 + $0x20] sm:$0xff] }
 0x16d   : > { %1355 = vmatprep.subr.bf16.mxu0 %v1354_v57  ;;  %1432 = vmatprep.subr.bf16.mxu1 %v1354_v57  ;;  %v966_v57 = vld [vmem:[%s2230_s6 + $0x1d8] sm:$0xff] }
 0x16e   : > { %v1386_v3 = vpack.c.bf16 %v966_v57, %v964_v55 }
 0x170   : > { %1357 = vmatpush1.bf16.msra.mxu0 %v1356_v2  ;;  %1448 = vmatpush1.bf16.msra.mxu1 %v1356_v2  ;;  %v841_v2 = vld [vmem:[#allocation2 + $0x30] sm:$0xff] }
 0x171   : > { %1359 = vmatprep.subr.bf16.mxu0 %v1358_v62  ;;  %1433 = vmatprep.subr.bf16.mxu1 %v1358_v62  ;;  %v968_v62 = vld [vmem:[%s2230_s6 + $0x1e8] sm:$0xff] }
 0x172   : > { %v1510_v36 = vpop.eup %1509  ;;  %v1390_v53 = vpack.c.bf16 %v970_v15, %v968_v62 }
 0x173   : > { %v822_v40 = vmul.f32 %v1510_v36, %v819_v31  ;;  %v845_v36 = vld [vmem:[#allocation2 + $0x50] sm:$0xff] }
 0x174   : > { %1361 = vmatpush1.bf16.msra.mxu0 %v1360_v5  ;;  %1449 = vmatpush1.bf16.msra.mxu1 %v1360_v5  ;;  %v967_v5 = vld [vmem:[%s2230_s6 + $0x1e0] sm:$0xff] }
 0x175   : > { %1363 = vmatprep.subr.bf16.mxu0 %v1362_v12  ;;  %1434 = vmatprep.subr.bf16.mxu1 %v1362_v12  ;;  %827 = vst.msk [vmem:[#allocation5] sm:$0x3] %vm2091_vm1, %v822_v40  ;;  %v829_v8 = vmul.f32 %v822_v40, %v2024_v0  ;;  %v1392_v27 = vpack.c.bf16 %v969_v6, %v967_v5 }
 0x177   : > { %v830_v47 = vsub.f32 %v828_v42, %v829_v8 }
 0x178   : > { %1365 = vmatpush1.bf16.msra.mxu0 %v1364_v21  ;;  %1450 = vmatpush1.bf16.msra.mxu1 %v1364_v21  ;;  %v843_v21 = vld [vmem:[#allocation2 + $0x40] sm:$0xff] }
 0x179   : > { %1367 = vmatprep.subr.bf16.mxu0 %v1366_v60  ;;  %1435 = vmatprep.subr.bf16.mxu1 %v1366_v60  ;;  %831 = vst.msk [vmem:[#allocation6] sm:$0x3] %vm2091_vm1, %v830_v47  ;;  %v1388_v60 = vpack.c.bf16 %v965_v59, %v963_v58 }
 0x17c   : > { %1369 = vmatpush1.bf16.msra.mxu0 %v1368_v24  ;;  %1451 = vmatpush1.bf16.msra.mxu1 %v1368_v24  ;;  %v847_v0 = vld [vmem:[#allocation5] sm:$0x3] }
 0x17d   : > { %1371 = vmatprep.subr.bf16.mxu0 %v1370_v25  ;;  %1436 = vmatprep.subr.bf16.mxu1 %v1370_v25  ;;  %v852_v4 = vrot.slane %v847_v0, %v2121_v52  ;;  %v856_v11 = vrot.slane %v847_v0, %v2123_v54 }
 0x17f   : > { %v860_v12 = vmul.f32 %v856_v11, %v836_v61  ;;  %v866_v16 = vmul.f32 %v856_v11, %v842_v56  ;;  %v859_v9 = vmul.f32 %v852_v4, %v835_v1  ;;  %v865_v10 = vmul.f32 %v852_v4, %v841_v2  ;;  %v971_v56 = vld [vmem:[%s2231_s7] sm:$0x3] }
 0x180   : > { %1373 = vmatpush1.bf16.msra.mxu0 %v1372_v30  ;;  %1452 = vmatpush1.bf16.msra.mxu1 %v1372_v30  ;;  %v871_v22 = vld [vmem:[#allocation6] sm:$0x3]  ;;  %v862_v17 = vmul.f32 %v856_v11, %v838_v13  ;;  %v868_v23 = vmul.f32 %v856_v11, %v844_v14  ;;  %v861_v18 = vmul.f32 %v852_v4, %v837_v19 }
 0x181   : > { %1375 = vmatprep.subr.bf16.mxu0 %v1374_v32  ;;  %1437 = vmatprep.subr.bf16.mxu1 %v1374_v32  ;;  %v876_v24 = vrot.slane %v871_v22, %v2121_v52  ;;  %v880_v25 = vrot.slane %v871_v22, %v2123_v54  ;;  %v864_v28 = vmul.f32 %v856_v11, %v840_v20 }
 0x182   : > { %v867_v29 = vmul.f32 %v852_v4, %v843_v21  ;;  %v870_v38 = vmul.f32 %v856_v11, %v846_v26  ;;  %v863_v42 = vmul.f32 %v852_v4, %v839_v34  ;;  %v980_v0 = vrot.slane %v971_v56, %v2123_v54 }
 0x183   : > { %v884_v30 = vadd.f32 %v880_v25, %v860_v12  ;;  %v890_v31 = vadd.f32 %v880_v25, %v866_v16  ;;  %v883_v32 = vadd.f32 %v876_v24, %v859_v9  ;;  %v889_v33 = vadd.f32 %v876_v24, %v865_v10 }
 0x184   : > { %1377 = vmatpush1.bf16.msra.mxu0 %v1376_v41  ;;  %1453 = vmatpush1.bf16.msra.mxu1 %v1376_v41  ;;  %v886_v7 = vadd.f32 %v880_v25, %v862_v17  ;;  %v892_v37 = vadd.f32 %v880_v25, %v868_v23  ;;  %v885_v8 = vadd.f32 %v876_v24, %v861_v18 }
 0x185   : > { %1379 = vmatprep.subr.bf16.mxu0 %v1378_v43  ;;  %1438 = vmatprep.subr.bf16.mxu1 %v1378_v43  ;;  %v896_v40 = vmax.f32 %v884_v30, 0.0  ;;  %v902_v41 = vmax.f32 %v890_v31, 0.0  ;;  %v869_v43 = vmul.f32 %v852_v4, %v845_v36  ;;  %v895_v35 = vmax.f32 %v883_v32, 0.0 }
 0x186   : > { %v901_v44 = vmax.f32 %v889_v33, 0.0  ;;  %v891_v45 = vadd.f32 %v876_v24, %v867_v29  ;;  %v898_v46 = vmax.f32 %v886_v7, 0.0  ;;  %v904_v39 = vmax.f32 %v892_v37, 0.0 }
 0x187   : > { %1047 = vmatprep.mubr.f32.mxu0 %v896_v40  ;;  %1065 = vmatprep.mubr.f32.mxu1 %v902_v41  ;;  %v888_v47 = vadd.f32 %v880_v25, %v864_v28  ;;  %v887_v51 = vadd.f32 %v876_v24, %v863_v42  ;;  %v893_v55 = vadd.f32 %v876_v24, %v869_v43 }
 0x188   : > { %1381 = vmatpush1.bf16.msra.mxu0 %v1380_v48  ;;  %1454 = vmatpush1.bf16.msra.mxu1 %v1380_v48  ;;  %v894_v48 = vadd.f32 %v880_v25, %v870_v38  ;;  %v903_v50 = vmax.f32 %v891_v45, 0.0 }
 0x189   : > { %1383 = vmatprep.subr.bf16.mxu0 %v1382_v49  ;;  %1439 = vmatprep.subr.bf16.mxu1 %v1382_v49  ;;  %v897_v49 = vmax.f32 %v885_v8, 0.0  ;;  %v900_v57 = vmax.f32 %v888_v47, 0.0  ;;  %v899_v59 = vmax.f32 %v887_v51, 0.0  ;;  %v905_v61 = vmax.f32 %v893_v55, 0.0 }
 0x18a   : > { %v906_v58 = vmax.f32 %v894_v48, 0.0 }
 0x18c   : > { %1385 = vmatpush1.bf16.msra.mxu0 %v1384_v63  ;;  %1455 = vmatpush1.bf16.msra.mxu1 %v1384_v63  ;;  %v976_v63 = vrot.slane %v971_v56, %v2121_v52 }
 0x18d   : > { %1387 = vmatprep.subr.bf16.mxu0 %v1386_v3  ;;  %1440 = vmatprep.subr.bf16.mxu1 %v1386_v3 }
 0x190   : > { %1389 = vmatpush1.bf16.msra.mxu0 %v1388_v60  ;;  %1456 = vmatpush1.bf16.msra.mxu1 %v1388_v60 }
 0x191   : > { %1391 = vmatprep.subr.bf16.mxu0 %v1390_v53  ;;  %1441 = vmatprep.subr.bf16.mxu1 %v1390_v53 }
 0x194   : > { %1393 = vmatpush1.bf16.msra.mxu0 %v1392_v27  ;;  %1457 = vmatpush1.bf16.msra.mxu1 %v1392_v27 }
 0x197   : > { %1048 = vmatmul.mubr.f32.vlgmr.msra.gmra.mrb[0].mxu0 %v895_v35  ;;  %1066 = vmatmul.mubr.f32.vlgmr.msra.gmra.mrb[0].mxu1 %v901_v44 }
 0x198   : > { %1053 = vmatprep.mubr.f32.mxu0 %v898_v46  ;;  %1071 = vmatprep.mubr.f32.mxu1 %v904_v39 }
 0x19b   : > { %1054 = vmatmul.mubr.f32.gmra.mrb[2].mxu0 %v897_v49  ;;  %1072 = vmatmul.mubr.f32.gmra.mrb[2].mxu1 %v903_v50 }
 0x19c   : > { %1059 = vmatprep.mubr.f32.mxu0 %v900_v57  ;;  %1077 = vmatprep.mubr.f32.mxu1 %v906_v58 }
 0x19f   : > { %1060 = vmatmul.mubr.f32.gmra.mrb[4].mxu0 %v899_v59  ;;  %1078 = vmatmul.mubr.f32.gmra.mrb[4].mxu1 %v905_v61 }
 0x26a   : > { %v1049_v1 = vpop.f32.mrb[0].mxu0  ;;  %v1067_v2 = vpop.f32.mrb[0].mxu1 }
 0x26b   : > { %v2158_v3 = vadd.f32 %v1049_v1, %v976_v63  ;;  %v2160_v62 = vadd.f32 %v1067_v2, %v976_v63  ;;  %v1051_v4 = vpop.f32.mrb[1].mxu0  ;;  %v1069_v11 = vpop.f32.mrb[1].mxu1 }
 0x26c   : > { %v2162_v13 = vadd.f32 %v1051_v4, %v980_v0  ;;  %v1070_v14 = vadd.f32 %v1069_v11, %v980_v0 }
 0x26d   : > { %v1090_v15 = vmul.f32 %v2160_v62, %v2160_v62  ;;  %v1084_v5 = vmul.f32 %v2158_v3, %v2158_v3 }
 0x26e   : > { %v1055_v52 = vpop.f32.mrb[2].mxu0  ;;  %v1073_v6 = vpop.f32.mrb[2].mxu1  ;;  %v1091_v54 = vmul.f32 %v1070_v14, %v1070_v14  ;;  %v1085_v12 = vmul.f32 %v2162_v13, %v2162_v13 }
 0x26f   : > { %v2170_v16 = vadd.f32 %v1055_v52, %v976_v63  ;;  %v1057_v9 = vpop.f32.mrb[3].mxu0  ;;  %v2172_v10 = vadd.f32 %v1073_v6, %v976_v63  ;;  %v1075_v19 = vpop.f32.mrb[3].mxu1 }
 0x270   : > { %v1058_v20 = vadd.f32 %v1057_v9, %v980_v0  ;;  %v2174_v21 = vadd.f32 %v1075_v19, %v980_v0  ;;  %v1105_v60 = vadd.f32 %v1091_v54, %v1090_v15  ;;  %v1096_v22 = vadd.f32 %v1085_v12, %v1084_v5 }
 0x271   : > { %v1086_v17 = vmul.f32 %v2170_v16, %v2170_v16  ;;  %v1092_v53 = vmul.f32 %v2172_v10, %v2172_v10 }
 0x272   : > { %v1087_v23 = vmul.f32 %v1058_v20, %v1058_v20  ;;  %v1093_v24 = vmul.f32 %v2174_v21, %v2174_v21  ;;  %1106 = vadd.xlane.f32.xlu1 %v1105_v60  ;;  %v1061_v25 = vpop.f32.mrb[4].mxu0  ;;  %1097 = vadd.xlane.f32.xlu0 %v1096_v22  ;;  %v1079_v26 = vpop.f32.mrb[4].mxu1 }
 0x273   : > { %v1062_v27 = vadd.f32 %v1061_v25, %v976_v63  ;;  %v1063_v18 = vpop.f32.mrb[5].mxu0  ;;  %v1080_v28 = vadd.f32 %v1079_v26, %v976_v63  ;;  %v1081_v29 = vpop.f32.mrb[5].mxu1 }
 0x274   : > { %v1064_v30 = vadd.f32 %v1063_v18, %v980_v0  ;;  %v1082_v31 = vadd.f32 %v1081_v29, %v980_v0  ;;  %v1099_v32 = vadd.f32 %v1087_v23, %v1086_v17  ;;  %v1108_v37 = vadd.f32 %v1093_v24, %v1092_v53 }
 0x275   : > { %v1088_v33 = vmul.f32 %v1062_v27, %v1062_v27  ;;  %v1094_v36 = vmul.f32 %v1080_v28, %v1080_v28 }
 0x276   : > { %v1089_v34 = vmul.f32 %v1064_v30, %v1064_v30  ;;  %v1095_v7 = vmul.f32 %v1082_v31, %v1082_v31  ;;  %1100 = vadd.xlane.f32.xlu0 %v1099_v32 }
 0x278   : > { %v1102_v38 = vadd.f32 %v1089_v34, %v1088_v33  ;;  %v1111_v40 = vadd.f32 %v1095_v7, %v1094_v36 }
 0x27a   : > { %1103 = vadd.xlane.f32.xlu1 %v1102_v38  ;;  %1109 = vadd.xlane.f32.xlu0 %v1108_v37 }
 0x27e   : > { %1112 = vadd.xlane.f32.xlu1 %v1111_v40 }
 0x2ff   : > { %v1107_v41 = vpop.xlane.xlu1 %1106  ;;  %v1098_v42 = vpop.xlane.xlu0 %1097 }
 0x300   : > { %v1117_v43 = vmax.f32 %v1107_v41, 1e-24  ;;  %v1114_v35 = vmax.f32 %v1098_v42, 1e-24 }
 0x302   : > { %1511 = vrsqrt.f32 %v1117_v43 }
 0x303   : > { %1513 = vrsqrt.f32 %v1114_v35  ;;  %v1101_v44 = vpop.xlane.xlu0 %1100 }
 0x304   : > { %v1115_v8 = vmax.f32 %v1101_v44, 1e-24 }
 0x306   : > { %1515 = vrsqrt.f32 %v1115_v8 }
 0x307   : > { %v1104_v45 = vpop.xlane.xlu1 %1103  ;;  %v1110_v46 = vpop.xlane.xlu0 %1109 }
 0x308   : > { %v1116_v39 = vmax.f32 %v1104_v45, 1e-24  ;;  %v1118_v47 = vmax.f32 %v1110_v46, 1e-24 }
 0x30a   : > { %1517 = vrsqrt.f32 %v1116_v39 }
 0x30b   : > { %1519 = vrsqrt.f32 %v1118_v47  ;;  %v1113_v48 = vpop.xlane.xlu1 %1112 }
 0x30c   : > { %v1512_v49 = vpop.eup %1511  ;;  %v1119_v50 = vmax.f32 %v1113_v48, 1e-24 }
 0x30d   : > { %v1514_v51 = vpop.eup %1513  ;;  %v1132_v55 = vmul.f32 %v1512_v49, %v2160_v62  ;;  %v1133_v57 = vmul.f32 %v1512_v49, %v1070_v14 }
 0x30e   : > { %v1126_v58 = vmul.f32 %v1514_v51, %v2158_v3  ;;  %v1127_v59 = vmul.f32 %v1514_v51, %v2162_v13  ;;  %1521 = vrsqrt.f32 %v1119_v50 }
 0x30f   : > { %1144 = vst [vmem:[#allocation7 + $0x30] sm:$0xff] %v1132_v55  ;;  %1145 = vst [vmem:[#allocation7 + $0x38] sm:$0xff] %v1133_v57 }
 0x310   : > { %v1516_v61 = vpop.eup %1515  ;;  %1138 = vst [vmem:[#allocation7] sm:$0xff] %v1126_v58  ;;  %1139 = vst [vmem:[#allocation7 + $0x8] sm:$0xff] %v1127_v59 }
 0x311   : > { %v1128_v56 = vmul.f32 %v1516_v61, %v2170_v16  ;;  %v1129_v63 = vmul.f32 %v1516_v61, %v1058_v20 }
 0x313   : > { %1140 = vst [vmem:[#allocation7 + $0x10] sm:$0xff] %v1128_v56  ;;  %1141 = vst [vmem:[#allocation7 + $0x18] sm:$0xff] %v1129_v63 }
 0x314   : > { %v1518_v0 = vpop.eup %1517 }
 0x315   : > { %v1520_v1 = vpop.eup %1519  ;;  %v1130_v2 = vmul.f32 %v1518_v0, %v1062_v27  ;;  %v1131_v62 = vmul.f32 %v1518_v0, %v1064_v30 }
 0x316   : > { %v1134_v4 = vmul.f32 %v1520_v1, %v2172_v10  ;;  %v1135_v3 = vmul.f32 %v1520_v1, %v2174_v21 }
 0x317   : > { %1142 = vst [vmem:[#allocation7 + $0x20] sm:$0xff] %v1130_v2  ;;  %1143 = vst [vmem:[#allocation7 + $0x28] sm:$0xff] %v1131_v62 }
 0x318   : > { %v1522_v11 = vpop.eup %1521  ;;  %1146 = vst [vmem:[#allocation7 + $0x40] sm:$0xff] %v1134_v4  ;;  %1147 = vst [vmem:[#allocation7 + $0x48] sm:$0xff] %v1135_v3 }
 0x319   : > { %v1136_v13 = vmul.f32 %v1522_v11, %v1080_v28  ;;  %v1137_v14 = vmul.f32 %v1522_v11, %v1082_v31 }
 0x31b   : > { %1148 = vst [vmem:[#allocation7 + $0x50] sm:$0xff] %v1136_v13  ;;  %1149 = vst [vmem:[#allocation7 + $0x58] sm:$0xff] %v1137_v14 }
 0x31c PF: > { %p2190_p6 = scmp.eq.s32.totalorder %s1252_s30, 1  ;;  %s1581_s18 = smov [#allocation7]  }
 0x31d   : > { %s1166_s19 = sshll.u32 %s1581_s18, 4  ;;  %s1167_s19 = int_to_ptr.vmem [resolvable:$true] %s1166_s19 }
 0x31e   : > { %s1523_s20 = scalar_lea.vmem %s1167_s19, 1536  ;;  %s1529_s21 = scalar_lea.vmem %s1167_s19, 3072 }
 0x31f   : > { %p1524_p7 = scmp.ne.s32.totalorder %s1167_s19, %s1523_s20  ;;  %p1530_p10 = scmp.lt.s32.totalorder %s1167_s19, %s1167_s19 }
 0x320   : > { %p1531_p11 = scmp.lt.s32.totalorder %s1529_s21, %s1523_s20 }
 0x321   : > { %p1525_p8 = pnand %p1524_p7, %p2190_p6 }
 0x322   : > { %p1532_p12 = por %p1531_p11, %p1530_p10 }
 0x323   : > { %p1526_p9 = pneg %p1525_p8 }
 0x325   : > { %p1533_p13 = pnand %p1532_p12, %p1526_p9 }
 0x327   : > { %1536 = shalt.err (!%p1533_p13)
}
 0x328   : > { %s1537_s23 = scalar_lea.hbm %s2232_s8, 1536 }
 0x329   : > { %p1538_p0 = scmp.ne.s32.totalorder %s2232_s8, %s1537_s23  ;;  %p1543_p3 = scmp.lt.u32.totalorder %s1537_s23, %s2232_s8 }
 0x32b   : > { %p1539_p1 = pnand %p1538_p0, %p2190_p6 }
 0x32d   : > { %p1540_p2 = pneg %p1539_p1 }
 0x32f   : > { %p1545_p4 = pnand %p1543_p3, %p1540_p2 }
 0x331   : > { %1548 = shalt.err (!%p1545_p4)
}
 0x332   : > { %s1582_s27 = smov 256   ;;  %s1583_s12 = smov 16  }
 0x333   : > { %1459 = dma.vmem_to_hbm [thread:$0]  (%p2190_p6), %s1167_s19, 1536, %s2232_s8, [#allocation8], %s1582_s27, %s1582_s27, %s1583_s12  }
 0x334 PF: > { %p1467_p5 = scmp.ge.s32.totalorder %s1575_s29, 2  ;;  %p1468_p7 = scmp.eq.s32.totalorder %s1253_s9, 1 }
 0x336   : > { %p1463_p8 = pnand %p1468_p7, %p1467_p5 }
 0x338   : > { %1562 = dma.done.wait (!%p1463_p8), [#allocation8], 1536  }
 0x339   : > { %1564 = vsyncadd (!%p1463_p8), [#allocation8], 4294965760  ;;  %s21_s29 = sadd.s32 1, %s1575_s29   ;;  %s2238_s27 = smov %s1571_s28 }
 0x33a   : > { %p18_p9 = scmp.ge.s32.totalorder %s21_s29, 4   ;;  %s2239_s28 = smov %s2241_s10 }
 0x33c   :  { %20 = sbr.rel (!%p18_p9) target bundleno = 3 (0x3), region = 109 }
 0x343   :  { %1187 = vsyncpa [#allocation8], 1 }
 0x344   :  { %1189 = vsyncpa [#allocation8 + $0x1], 1 }

</bundles_post_ra>
